<compile_context>
chip_gen: v7x
topology: tpu7x:2x2x1
jax: 0.10.0
libtpu: 0.0.40
codegen_flags: <defaults>
</compile_context>

<pallas_src>
import functools
import math

import jax
import jax.numpy as jnp
from jax.experimental import pallas as pl
from jax.experimental.pallas import tpu as pltpu


def _embed_onehot_kernel(ids_ref, emb_ref, out_ref, *, scale):
    """One tile: gather `block_tokens` rows via a one-hot MXU matmul and scale.

    ids_ref : VMEM ref, (block_tokens, 1) int32 token ids (sublane-major)
    emb_ref : VMEM ref, (vocab_pad, d_model) padded embedding table
    out_ref : VMEM ref, (block_tokens, d_model) output tile
    """
    block_tokens = out_ref.shape[0]
    vocab_pad = emb_ref.shape[0]

    ids = ids_ref[...]                                               # (bt, 1)
    col = jax.lax.broadcasted_iota(jnp.int32, (block_tokens, vocab_pad), 1)
    onehot = (ids == col).astype(emb_ref.dtype)                      # (bt, vocab_pad)

    # One-hot selection on the MXU. HIGHEST precision keeps the f32 rows exact
    # (one-hot * row reconstructs the row bit-for-bit up to the last ulp).
    gathered = jnp.dot(
        onehot,
        emb_ref[...],
        preferred_element_type=jnp.float32,
        precision=jax.lax.Precision.HIGHEST,
    )
    out_ref[...] = (gathered * scale).astype(out_ref.dtype)


def input_embedding(x, emb_table, *, block_tokens=256):
    """Pallas equivalent of InputEmbedding.forward: embedding(x) * sqrt(d_model)."""
    vocab_size, d_model = emb_table.shape
    scale = float(math.sqrt(d_model))

    batch, seq = x.shape
    n_tok = batch * seq

    # Pad the MXU contraction dim (vocab) to a lane multiple of 128.
    vocab_pad = max(128, ((vocab_size + 127) // 128) * 128)
    emb_padded = emb_table
    if vocab_pad != vocab_size:
        emb_padded = jnp.pad(emb_table, ((0, vocab_pad - vocab_size), (0, 0)))

    # Pad the token count to a multiple of the tile size; slice off afterwards.
    n_tiles = pl.cdiv(n_tok, block_tokens)
    n_tok_pad = n_tiles * block_tokens
    ids = x.reshape(n_tok).astype(jnp.int32)
    if n_tok_pad != n_tok:
        ids = jnp.pad(ids, (0, n_tok_pad - n_tok))
    ids = ids.reshape(n_tok_pad, 1)  # sublane-major ids -> no in-kernel transpose

    # VMEM budget: table + ids/out tiles (double-buffered worst case) + one-hot.
    needed_bytes = 4 * (
        2 * vocab_pad * d_model          # table (worst case double-buffered)
        + 2 * block_tokens * d_model     # output tiles
        + 2 * block_tokens * 128         # ids tiles (lane-padded)
        + 2 * block_tokens * vocab_pad   # one-hot intermediate
    )
    vmem_limit = min(max(2 * needed_bytes, 16 * 1024 * 1024), 64 * 1024 * 1024)

    out_flat = pl.pallas_call(
        functools.partial(_embed_onehot_kernel, scale=scale),
        out_shape=jax.ShapeDtypeStruct((n_tok_pad, d_model), emb_table.dtype),
        grid=(n_tiles,),
        in_specs=[
            # Per-tile token ids (VMEM-blocked, not SMEM scalar-prefetch).
            pl.BlockSpec((block_tokens, 1), lambda i: (i, 0)),
            # Full (small) embedding table; constant block index so it is not
            # re-fetched across grid steps.
            pl.BlockSpec((vocab_pad, d_model), lambda i: (0, 0)),
        ],
        out_specs=pl.BlockSpec((block_tokens, d_model), lambda i: (i, 0)),
        compiler_params=pltpu.CompilerParams(
            dimension_semantics=("parallel",),
            vmem_limit_bytes=vmem_limit,
        ),
    )(ids, emb_padded)

    return out_flat[:n_tok].reshape(batch, seq, d_model)


if __name__ == "__main__":
    # Small, deterministic setup consistent with the module's __init__.
    d_model = 128
    vocab_size = 64
    batch, seq = 2, 8

    key = jax.random.PRNGKey(0)
    k_emb, k_ids = jax.random.split(key)

    # nn.Embedding default init is N(0, 1); reproduce deterministically.
    emb_table = jax.random.normal(k_emb, (vocab_size, d_model), dtype=jnp.float32)
    x = jax.random.randint(k_ids, (batch, seq), 0, vocab_size, dtype=jnp.int32)

    out = input_embedding(x, emb_table)
    out = jax.block_until_ready(out)

    # Pure-JAX reference for sanity.
    ref = jnp.take(emb_table, x, axis=0) * math.sqrt(d_model)
    assert out.shape == (batch, seq, d_model)
    assert jnp.allclose(out, ref, atol=1e-4, rtol=1e-4), float(
        jnp.max(jnp.abs(out - ref))
    )

    print("KERNEL_OK")
</pallas_src>

<mosaic_0001>
module attributes {stable_mosaic.version = 11 : i64} {
  func.func @_embed_onehot_kernel(%arg0: i32, %arg1: memref<256x1xi32, #tpu.memory_space<vmem>>, %arg2: memref<128x128xf32, #tpu.memory_space<vmem>>, %arg3: memref<256x128xf32, #tpu.memory_space<vmem>>) attributes {dimension_semantics = [#tpu.dimension_semantics<parallel>], iteration_bounds = array<i64: 1>, scalar_prefetch = 0 : i64, scratch_operands = 0 : i64, tpu.core_type = #tpu.core_type<tc>, window_params = [{transform_indices = @transform_0, window_bounds = array<i64: 256, 1>}, {pipeline_mode = #tpu.pipeline_mode<synchronous>, transform_indices = @transform_1, window_bounds = array<i64: 128, 128>}, {transform_indices = @transform_2, window_bounds = array<i64: 256, 128>}]} {
    %c0 = arith.constant 0 : index
    %c0_0 = arith.constant 0 : index
    %0 = vector.load %arg1[%c0, %c0_0] : memref<256x1xi32, #tpu.memory_space<vmem>>, vector<256x1xi32>
    %1 = tpu.iota {dimensions = array<i32: 1>} : vector<256x128xi32>
    %2 = vector.broadcast %0 : vector<256x1xi32> to vector<256x128xi32>
    %3 = arith.cmpi eq, %2, %1 : vector<256x128xi32>
    %4 = arith.extui %3 : vector<256x128xi1> to vector<256x128xi32>
    %5 = arith.sitofp %4 : vector<256x128xi32> to vector<256x128xf32>
    %c0_1 = arith.constant 0 : index
    %c0_2 = arith.constant 0 : index
    %6 = vector.load %arg2[%c0_1, %c0_2] : memref<128x128xf32, #tpu.memory_space<vmem>>, vector<128x128xf32>
    %cst = arith.constant dense<0.000000e+00> : vector<256x128xf32>
    %7 = tpu.matmul %5, %6, %cst {dimension_numbers = #tpu.dot_dimension_numbers<[1], [0], [0], [1], [0, 0, 1, 1], [], []>, precision = #tpu.contract_precision<fp32>} : vector<256x128xf32>, vector<128x128xf32>, vector<256x128xf32> -> vector<256x128xf32>
    %cst_3 = arith.constant 11.3137083 : f32
    %8 = vector.broadcast %cst_3 : f32 to vector<256x128xf32>
    %9 = arith.mulf %7, %8 : vector<256x128xf32>
    %c0_4 = arith.constant 0 : index
    %c0_5 = arith.constant 0 : index
    %10 = vector.load %arg3[%c0_4, %c0_5] : memref<256x128xf32, #tpu.memory_space<vmem>>, vector<256x128xf32>
    tpu.vector_store %arg3[%c0_4, %c0_5], %9 {strides = array<i32>} : memref<256x128xf32, #tpu.memory_space<vmem>>, vector<256x128xf32>,
    return
  }
  func.func @transform_0(%arg0: i32) -> (i32, i32) {
    %c0_i32 = arith.constant 0 : i32
    %c0_i32_0 = arith.constant 0 : i32
    return %arg0, %c0_i32 : i32, i32
  }
  func.func @transform_1(%arg0: i32) -> (i32, i32) {
    %c0_i32 = arith.constant 0 : i32
    %c0_i32_0 = arith.constant 0 : i32
    %c0_i32_1 = arith.constant 0 : i32
    return %c0_i32, %c0_i32_0 : i32, i32
  }
  func.func @transform_2(%arg0: i32) -> (i32, i32) {
    %c0_i32 = arith.constant 0 : i32
    %c0_i32_0 = arith.constant 0 : i32
    return %arg0, %c0_i32 : i32, i32
  }
}

</mosaic_0001>

<bundles_post_ra>
// kernel: tpu_custom_call.1
= control target key start
LH: loop header
LB: loop body
LE: loop exit
PB: predicated region body
PF: predicated region fallthrough
CT: control target
= control target key end

     0   :  { %v3588_v2 = vmov 0   ;;  %s4875_s0 = inlined_call_operand.vmem [shape: s32[256,1], index: 0, kind: input, shape index: {}]   ;;  %s4876_s1 = inlined_call_operand.vmem [shape: f32[128,128], index: 1, kind: input, shape index: {}]   ;;  %s4877_s2 = inlined_call_operand.hbm [shape: f32[256,128], index: 2, kind: output, shape index: {}]  }
   0x1   :  { %v14_v0 = vld [vmem:[%s4875_s0 + $0x10] sm:$0xff]  ;;  %v12_v1 = vld [vmem:[%s4875_s0] sm:$0xff]  ;;  %3563 = vset.pattern.permute.xlu1 %v3588_v2  ;;  %3562 = vset.pattern.permute.xlu0 %v3588_v2  ;;  %v15_v3 = vld [vmem:[%s4875_s0 + $0x18] sm:$0xff] }
   0x2   :  { %53 = vperm.xlu1 %3563, %v14_v0   ;;  %47 = vperm.xlu0 %3562, %v12_v1   ;;  %v13_v4 = vld [vmem:[%s4875_s0 + $0x8] sm:$0xff]  ;;  %v16_v6 = vld [vmem:[%s4875_s0 + $0x20] sm:$0xff]  ;;  %v19_v7 = vld [vmem:[%s4875_s0 + $0x38] sm:$0xff] }
   0x3   :  { %v17_v5 = vld [vmem:[%s4875_s0 + $0x28] sm:$0xff]  ;;  %v18_v8 = vld [vmem:[%s4875_s0 + $0x30] sm:$0xff]  ;;  %v3636_v9 = vld [vmem:[%s4876_s1] sm:$0xff] }
   0x4   :  { %v3641_v10 = vld [vmem:[%s4876_s1 + $0x8] sm:$0xff]  ;;  %v255_v11 = vand.u32 4294901760, %v3636_v9  ;;  %v240_v12 = vld [vmem:[%s4876_s1 + $0x10] sm:$0xff]  ;;  %v241_v13 = vld [vmem:[%s4876_s1 + $0x18] sm:$0xff] }
   0x5   :  { %v258_v14 = vand.u32 4294901760, %v3641_v10  ;;  %v261_v15 = vand.u32 4294901760, %v240_v12  ;;  %v264_v16 = vand.u32 4294901760, %v241_v13  ;;  %v3654_v17 = vld [vmem:[%s4876_s1 + $0x20] sm:$0xff]  ;;  %v3659_v18 = vld [vmem:[%s4876_s1 + $0x28] sm:$0xff]  ;;  %v3680_v25 = vld [vmem:[%s4876_s1 + $0x30] sm:$0xff] }
   0x6   :  { %56 = vperm.xlu1 %3563, %v15_v3   ;;  %50 = vperm.xlu0 %3562, %v13_v4   ;;  %v21_v20 = vld [vmem:[%s4875_s0 + $0x48] sm:$0xff]  ;;  %v20_v21 = vld [vmem:[%s4875_s0 + $0x40] sm:$0xff]  ;;  %v267_v23 = vand.u32 4294901760, %v3654_v17  ;;  %v270_v24 = vand.u32 4294901760, %v3659_v18  ;;  %v3685_v26 = vld [vmem:[%s4876_s1 + $0x38] sm:$0xff] }
   0x7   :  { %v3663_v19 = vpack.c.bf16 %v258_v14, %v255_v11  ;;  %v3671_v22 = vpack.c.bf16 %v264_v16, %v261_v15 }
   0x9   :  { %3301 = vmatprep.subr.bf16.mxu0 %v3663_v19  ;;  %3205 = vmatprep.subr.bf16.mxu1 %v3663_v19 }
   0xa   :  { %62 = vperm.xlu1 %3563, %v17_v5   ;;  %59 = vperm.xlu0 %3562, %v16_v6  }
   0xe   :  { %68 = vperm.xlu1 %3563, %v19_v7   ;;  %65 = vperm.xlu0 %3562, %v18_v8  }
   0xf   :  { %7 = vsyncpa [#allocation3], 0  ;;  %3303 = vmatpush3.bf16.msra.mxu0 %v3663_v19  ;;  %3207 = vmatpush3.bf16.msra.mxu1 %v3663_v19  ;;  %v23_v27 = vld [vmem:[%s4875_s0 + $0x58] sm:$0xff]  ;;  %v22_v28 = vld [vmem:[%s4875_s0 + $0x50] sm:$0xff]  ;;  %v3701_v29 = vpack.c.bf16 %v270_v24, %v267_v23  ;;  %v273_v30 = vand.u32 4294901760, %v3680_v25  ;;  %v276_v31 = vand.u32 4294901760, %v3685_v26  ;;  %v3743_v41 = vsub.f32 %v240_v12, %v261_v15 }
  0x10   :  { %3305 = vmatprep.subr.bf16.mxu0 %v3671_v22  ;;  %3209 = vmatprep.subr.bf16.mxu1 %v3671_v22  ;;  %v3708_v32 = vld [vmem:[%s4876_s1 + $0x40] sm:$0xff]  ;;  %v3713_v33 = vld [vmem:[%s4876_s1 + $0x48] sm:$0xff]  ;;  %v3736_v39 = vld [vmem:[%s4876_s1 + $0x50] sm:$0xff]  ;;  %v3745_v42 = vsub.f32 %v241_v13, %v264_v16  ;;  %v3775_v51 = vsub.f32 %v3636_v9, %v255_v11  ;;  %v3778_v52 = vsub.f32 %v3641_v10, %v258_v14 }
  0x11   :  { %v25_v34 = vld [vmem:[%s4875_s0 + $0x68] sm:$0xff]  ;;  %v24_v35 = vld [vmem:[%s4875_s0 + $0x60] sm:$0xff]  ;;  %v3729_v36 = vpack.c.bf16 %v276_v31, %v273_v30  ;;  %v279_v37 = vand.u32 4294901760, %v3708_v32  ;;  %v282_v38 = vand.u32 4294901760, %v3713_v33  ;;  %v3741_v40 = vld [vmem:[%s4876_s1 + $0x58] sm:$0xff]  ;;  %v285_v43 = vand.u32 4294901760, %v3736_v39 }
  0x12   :  { %74 = vperm.xlu1 %3563, %v21_v20   ;;  %71 = vperm.xlu0 %3562, %v20_v21   ;;  %v672_v44 = vand.u32 4294901760, %v3743_v41  ;;  %v679_v45 = vand.u32 4294901760, %v3745_v42  ;;  %v27_v46 = vld [vmem:[%s4875_s0 + $0x78] sm:$0xff]  ;;  %v26_v47 = vld [vmem:[%s4875_s0 + $0x70] sm:$0xff]  ;;  %v288_v49 = vand.u32 4294901760, %v3741_v40  ;;  %v3770_v50 = vld [vmem:[%s4876_s1 + $0x60] sm:$0xff]  ;;  %v3824_v5 = vsub.f32 %v3654_v17, %v267_v23 }
  0x13   :  { %3307 = vmatpush3.bf16.msra.mxu0 %v3671_v22  ;;  %3211 = vmatpush3.bf16.msra.mxu1 %v3671_v22  ;;  %v3764_v48 = vpack.c.bf16 %v282_v38, %v279_v37  ;;  %v3783_v53 = vld [vmem:[%s4876_s1 + $0x68] sm:$0xff]  ;;  %v291_v57 = vand.u32 4294901760, %v3770_v50  ;;  %v28_v61 = vld [vmem:[%s4875_s0 + $0x80] sm:$0xff]  ;;  %v3810_v0 = vld [vmem:[%s4876_s1 + $0x70] sm:$0xff]  ;;  %v658_v1 = vand.u32 4294901760, %v3775_v51  ;;  %v665_v2 = vand.u32 4294901760, %v3778_v52 }
  0x14   :  { %3309 = vmatprep.subr.bf16.mxu0 %v3701_v29  ;;  %3213 = vmatprep.subr.bf16.mxu1 %v3701_v29  ;;  %v673_v54 = vsub.f32 %v3743_v41, %v672_v44  ;;  %v680_v55 = vsub.f32 %v3745_v42, %v679_v45  ;;  %v3787_v56 = vpack.c.bf16 %v679_v45, %v672_v44  ;;  %v29_v60 = vld [vmem:[%s4875_s0 + $0x88] sm:$0xff]  ;;  %v294_v63 = vand.u32 4294901760, %v3783_v53  ;;  %v3817_v3 = vld [vmem:[%s4876_s1 + $0x78] sm:$0xff]  ;;  %v30_v11 = vld [vmem:[%s4875_s0 + $0x90] sm:$0xff] }
  0x15   :  { %v3804_v62 = vpack.c.bf16 %v288_v49, %v285_v43  ;;  %v3829_v6 = vsub.f32 %v3659_v18, %v270_v24  ;;  %v297_v7 = vand.u32 4294901760, %v3810_v0  ;;  %v686_v8 = vand.u32 4294901760, %v3824_v5  ;;  %v31_v10 = vld [vmem:[%s4875_s0 + $0x98] sm:$0xff]  ;;  %v33_v23 = vld [vmem:[%s4875_s0 + $0xa8] sm:$0xff]  ;;  %v32_v24 = vld [vmem:[%s4875_s0 + $0xa0] sm:$0xff] }
  0x16   :  { %80 = vperm.xlu1 %3563, %v23_v27   ;;  %77 = vperm.xlu0 %3562, %v22_v28   ;;  %v674_v58 = vand.u32 4294901760, %v673_v54  ;;  %v681_v59 = vand.u32 4294901760, %v680_v55  ;;  %v3848_v12 = vpack.c.bf16 %v294_v63, %v291_v57  ;;  %v300_v13 = vand.u32 4294901760, %v3817_v3 }
  0x17   :  { %3311 = vmatpush3.bf16.msra.mxu0 %v3701_v29  ;;  %3215 = vmatpush3.bf16.msra.mxu1 %v3701_v29  ;;  %v693_v9 = vand.u32 4294901760, %v3829_v6  ;;  %v659_v14 = vsub.f32 %v3775_v51, %v658_v1  ;;  %v666_v15 = vsub.f32 %v3778_v52, %v665_v2  ;;  %v687_v16 = vsub.f32 %v3824_v5, %v686_v8 }
  0x18   :  { %3313 = vmatprep.subr.bf16.mxu0 %v3729_v36  ;;  %3217 = vmatprep.subr.bf16.mxu1 %v3729_v36  ;;  %v3819_v4 = vpack.c.bf16 %v681_v59, %v674_v58  ;;  %v3871_v27 = vpack.c.bf16 %v300_v13, %v297_v7  ;;  %v3878_v44 = vsub.f32 %v3680_v25, %v273_v30  ;;  %v35_v25 = vld [vmem:[%s4875_s0 + $0xb8] sm:$0xff]  ;;  %v34_v30 = vld [vmem:[%s4875_s0 + $0xb0] sm:$0xff] }
  0x19   :  { %v694_v17 = vsub.f32 %v3829_v6, %v693_v9  ;;  %v3855_v18 = vpack.c.bf16 %v693_v9, %v686_v8  ;;  %v688_v20 = vand.u32 4294901760, %v687_v16  ;;  %v660_v28 = vand.u32 4294901760, %v659_v14  ;;  %v39_v14 = vld [vmem:[%s4875_s0 + $0xd8] sm:$0xff] }
  0x1a   :  { %86 = vperm.xlu1 %3563, %v25_v34   ;;  %83 = vperm.xlu0 %3562, %v24_v35   ;;  %v667_v34 = vand.u32 4294901760, %v666_v15  ;;  %v3883_v45 = vsub.f32 %v3685_v26, %v276_v31  ;;  %v3899_v31 = vpack.c.bf16 %v665_v2, %v658_v1  ;;  %v36_v1 = vld [vmem:[%s4875_s0 + $0xc0] sm:$0xff]  ;;  %v713_v8 = vsub.f32 %v3708_v32, %v279_v37  ;;  %v38_v15 = vld [vmem:[%s4875_s0 + $0xd0] sm:$0xff]  ;;  %v41_v37 = vld [vmem:[%s4875_s0 + $0xe8] sm:$0xff] }
  0x1b   :  { %3315 = vmatpush3.bf16.msra.mxu0 %v3729_v36  ;;  %3219 = vmatpush3.bf16.msra.mxu1 %v3729_v36  ;;  %v695_v21 = vand.u32 4294901760, %v694_v17  ;;  %v720_v9 = vsub.f32 %v3713_v33, %v282_v38  ;;  %v40_v38 = vld [vmem:[%s4875_s0 + $0xe0] sm:$0xff] }
  0x1c   :  { %3317 = vmatprep.subr.bf16.mxu0 %v3764_v48  ;;  %3221 = vmatprep.subr.bf16.mxu1 %v3764_v48  ;;  %v3897_v26 = vpack.c.bf16 %v667_v34, %v660_v28 }
  0x1d   :  { %v3873_v35 = vpack.c.bf16 %v695_v21, %v688_v20 }
  0x1e   :  { %92 = vperm.xlu1 %3563, %v27_v46   ;;  %89 = vperm.xlu0 %3562, %v26_v47   ;;  %v700_v46 = vand.u32 4294901760, %v3878_v44  ;;  %v707_v47 = vand.u32 4294901760, %v3883_v45 }
  0x1f   :  { %3319 = vmatpush3.bf16.msra.mxu0 %v3764_v48  ;;  %3223 = vmatpush3.bf16.msra.mxu1 %v3764_v48 }
  0x20   :  { %3321 = vmatprep.subr.bf16.mxu0 %v3804_v62  ;;  %3225 = vmatprep.subr.bf16.mxu1 %v3804_v62  ;;  %v701_v54 = vsub.f32 %v3878_v44, %v700_v46  ;;  %v708_v55 = vsub.f32 %v3883_v45, %v707_v47  ;;  %v3903_v58 = vpack.c.bf16 %v707_v47, %v700_v46  ;;  %v43_v46 = vld [vmem:[%s4875_s0 + $0xf8] sm:$0xff]  ;;  %v42_v47 = vld [vmem:[%s4875_s0 + $0xf0] sm:$0xff] }
  0x22   :  { %98 = vperm.xlu1 %3563, %v29_v60   ;;  %95 = vperm.xlu0 %3562, %v28_v61   ;;  %v702_v59 = vand.u32 4294901760, %v701_v54  ;;  %v709_v60 = vand.u32 4294901760, %v708_v55  ;;  %v37_v61 = vld [vmem:[%s4875_s0 + $0xc8] sm:$0xff]  ;;  %s3591_s0 = smov [#allocation2]  }
  0x23   :  { %3323 = vmatpush3.bf16.msra.mxu0 %v3804_v62  ;;  %3227 = vmatpush3.bf16.msra.mxu1 %v3804_v62  ;;  %s2297_s20 = sshll.u32 %s3591_s0, 4  ;;  %s2298_s20 = int_to_ptr.vmem [resolvable:$true] %s2297_s20 }
  0x24   :  { %3325 = vmatprep.subr.bf16.mxu0 %v3848_v12  ;;  %3229 = vmatprep.subr.bf16.mxu1 %v3848_v12  ;;  %v3915_v2 = vpack.c.bf16 %v709_v60, %v702_v59  ;;  %s3564_s1 = scalar_lea.vmem %s2298_s20, 4096  ;;  %p3569_p1 = scmp.lt.s32.totalorder %s2298_s20, %s2298_s20 }
  0x25   :  { %p3565_p0 = scmp.ne.s32.totalorder %s2298_s20, %s3564_s1  ;;  %p3570_p2 = scmp.lt.s32.totalorder %s3564_s1, %s3564_s1 }
  0x26   :  { %104 = vperm.xlu1 %3563, %v31_v10   ;;  %101 = vperm.xlu0 %3562, %v30_v11   ;;  %v714_v10 = vand.u32 4294901760, %v713_v8  ;;  %v721_v11 = vand.u32 4294901760, %v720_v9 }
  0x27   :  { %3327 = vmatpush3.bf16.msra.mxu0 %v3848_v12  ;;  %3231 = vmatpush3.bf16.msra.mxu1 %v3848_v12  ;;  %p3571_p3 = por %p3570_p2, %p3569_p1 }
  0x28   :  { %3329 = vmatprep.subr.bf16.mxu0 %v3871_v27  ;;  %3233 = vmatprep.subr.bf16.mxu1 %v3871_v27  ;;  %v715_v16 = vsub.f32 %v713_v8, %v714_v10  ;;  %v722_v17 = vsub.f32 %v720_v9, %v721_v11  ;;  %v3929_v20 = vpack.c.bf16 %v721_v11, %v714_v10 }
  0x29   :  { %v755_v11 = vsub.f32 %v3810_v0, %v297_v7  ;;  %v3977_v0 = vpack.c.bf16 %v3778_v52, %v3775_v51  ;;  %v3985_v7 = vpack.c.bf16 %v3829_v6, %v3824_v5  ;;  %p3572_p4 = pnand %p3571_p3, %p3565_p0 }
  0x2a   :  { %110 = vperm.xlu1 %3563, %v33_v23   ;;  %107 = vperm.xlu0 %3562, %v32_v24   ;;  %v716_v32 = vand.u32 4294901760, %v715_v16  ;;  %v723_v33 = vand.u32 4294901760, %v722_v17  ;;  %v727_v23 = vsub.f32 %v3736_v39, %v285_v43  ;;  %v734_v24 = vsub.f32 %v3741_v40, %v288_v49 }
  0x2b   :  { %3331 = vmatpush3.bf16.msra.mxu0 %v3871_v27  ;;  %3235 = vmatpush3.bf16.msra.mxu1 %v3871_v27  ;;  %v741_v43 = vsub.f32 %v3770_v50, %v291_v57  ;;  %v748_v49 = vsub.f32 %v3783_v53, %v294_v63  ;;  %v762_v50 = vsub.f32 %v3817_v3, %v300_v13 }
  0x2c   :  { %3237 = vmatprep.subr.bf16.mxu1 %v3897_v26  ;;  %3333 = vmatprep.subr.bf16.mxu0 %v3899_v31  ;;  %v3937_v21 = vpack.c.bf16 %v723_v33, %v716_v32  ;;  %v728_v28 = vand.u32 4294901760, %v727_v23  ;;  %v735_v34 = vand.u32 4294901760, %v734_v24  ;;  %v3981_v3 = vpack.c.bf16 %v3745_v42, %v3743_v41 }
  0x2d   :  { %v742_v59 = vand.u32 4294901760, %v741_v43  ;;  %v749_v60 = vand.u32 4294901760, %v748_v49  ;;  %v763_v53 = vand.u32 4294901760, %v762_v50  ;;  %v3989_v13 = vpack.c.bf16 %v3883_v45, %v3878_v44 }
  0x2e   :  { %116 = vperm.xlu1 %3563, %v35_v25   ;;  %113 = vperm.xlu0 %3562, %v34_v30   ;;  %v729_v25 = vsub.f32 %v727_v23, %v728_v28  ;;  %v736_v30 = vsub.f32 %v734_v24, %v735_v34  ;;  %v3951_v54 = vpack.c.bf16 %v735_v34, %v728_v28  ;;  %v4878_v42 = vmov 0.0  }
  0x2f   :  { %v3961_v10 = vpack.c.bf16 %v749_v60, %v742_v59  ;;  %v764_v17 = vsub.f32 %v762_v50, %v763_v53  ;;  %v3991_v28 = vpack.c.bf16 %v720_v9, %v713_v8  ;;  %v3993_v34 = vpack.c.bf16 %v734_v24, %v727_v23 }
  0x30   :  { %v730_v39 = vand.u32 4294901760, %v729_v25  ;;  %v737_v40 = vand.u32 4294901760, %v736_v30  ;;  %v4023_v23 = vpack.c.bf16 %v762_v50, %v755_v11 }
  0x32   :  { %122 = vperm.xlu1 %3563, %v37_v61   ;;  %119 = vperm.xlu0 %3562, %v36_v1   ;;  %v3959_v55 = vpack.c.bf16 %v737_v40, %v730_v39  ;;  %v743_v61 = vsub.f32 %v741_v43, %v742_v59  ;;  %v750_v1 = vsub.f32 %v748_v49, %v749_v60 }
  0x34   :  { %v744_v57 = vand.u32 4294901760, %v743_v61 }
  0x36   :  { %128 = vperm.xlu1 %3563, %v39_v14   ;;  %125 = vperm.xlu0 %3562, %v38_v15   ;;  %v751_v14 = vand.u32 4294901760, %v750_v1  ;;  %v756_v15 = vand.u32 4294901760, %v755_v11 }
  0x38   :  { %v3969_v63 = vpack.c.bf16 %v751_v14, %v744_v57  ;;  %v757_v16 = vsub.f32 %v755_v11, %v756_v15  ;;  %v3971_v32 = vpack.c.bf16 %v763_v53, %v756_v15 }
  0x3a   :  { %134 = vperm.xlu1 %3563, %v41_v37   ;;  %131 = vperm.xlu0 %3562, %v40_v38   ;;  %v758_v33 = vand.u32 4294901760, %v757_v16  ;;  %v765_v37 = vand.u32 4294901760, %v764_v17 }
  0x3c   :  { %v3973_v38 = vpack.c.bf16 %v765_v37, %v758_v33 }
  0x3e   :  { %140 = vperm.xlu1 %3563, %v43_v46   ;;  %137 = vperm.xlu0 %3562, %v42_v47   ;;  %v44_v46 = vlaneseq  ;;  %v3995_v47 = vpack.c.bf16 %v748_v49, %v741_v43 }
  0x40   :  { %v3997_v51 = vand.u32 127, %v44_v46 }
  0x81   :  { %v3999_v52 = vpop.permute.xlu1 %53  ;;  %v4001_v41 = vpop.permute.xlu0 %47 }
  0x82   :  { %vm144_vm0 = vcmp.eq.s32.totalorder %v3999_v52, %v3997_v51  ;;  %vm142_vm1 = vcmp.eq.s32.totalorder %v4001_v41, %v3997_v51 }
  0x83   :  { %v2310_v5 = vsel %vm144_vm0, 1.0, %v4878_v42  ;;  %v2308_v6 = vsel %vm142_vm1, 1.0, %v4878_v42 }
  0x84   :  { %v4015_v44 = vsub.f32 %v2310_v5, %v2310_v5  ;;  %v4017_v45 = vsub.f32 %v2308_v6, %v2308_v6 }
  0x85   :  { %v4019_v8 = vpop.permute.xlu1 %56  ;;  %v4021_v9 = vpop.permute.xlu0 %50 }
  0x86   :  { %4935 = vst [vmem:[#allocation5_spill] sm:$0xff] %v4015_v44  ;;  %4936 = vst [vmem:[#allocation6_spill] sm:$0xff] %v4017_v45  ;;  %vm145_vm2 = vcmp.eq.s32.totalorder %v4019_v8, %v3997_v51  ;;  %vm143_vm3 = vcmp.eq.s32.totalorder %v4021_v9, %v3997_v51  ;;  %v337_v24 = vand.u32 4294901760, %v4017_v45  ;;  %v357_v39 = vand.u32 4294901760, %v4015_v44 }
  0x87   :  { %v2311_v25 = vsel %vm145_vm2, 1.0, %v4878_v42  ;;  %v2309_v30 = vsel %vm143_vm3, 1.0, %v4878_v42 }
  0x88   :  { %v4039_v40 = vsub.f32 %v2311_v25, %v2311_v25  ;;  %v4041_v43 = vsub.f32 %v2309_v30, %v2309_v30  ;;  %2996 = vmatprep.mubr.f32.mxu0 %v337_v24  ;;  %v338_v49 = vsub.f32 %v4017_v45, %v337_v24  ;;  %v358_v14 = vsub.f32 %v4015_v44, %v357_v39 }
  0x89   :  { %v4044_v59 = vpop.permute.xlu1 %62  ;;  %v4046_v60 = vpop.permute.xlu0 %59 }
  0x8a   :  { %4937 = vst [vmem:[#allocation7_spill] sm:$0xff] %v4039_v40  ;;  %4938 = vst [vmem:[#allocation8_spill] sm:$0xff] %v4041_v43  ;;  %vm147_vm4 = vcmp.eq.s32.totalorder %v4044_v59, %v3997_v51  ;;  %vm146_vm5 = vcmp.eq.s32.totalorder %v4046_v60, %v3997_v51  ;;  %v339_v61 = vand.u32 4294901760, %v338_v49  ;;  %v347_v1 = vand.u32 4294901760, %v4041_v43 }
  0x8b   :  { %v2313_v11 = vsel %vm147_vm4, 1.0, %v4878_v42  ;;  %v2312_v50 = vsel %vm146_vm5, 1.0, %v4878_v42  ;;  %v367_v57 = vand.u32 4294901760, %v4039_v40  ;;  %v359_v24 = vand.u32 4294901760, %v358_v14 }
  0x8c   :  { %v4063_v15 = vsub.f32 %v2313_v11, %v2313_v11  ;;  %v4065_v53 = vsub.f32 %v2312_v50, %v2312_v50  ;;  %2756 = vmatprep.mubr.f32.mxu1 %v339_v61  ;;  %2997 = vmatmul.mubr.f32.vlgmr.msra.gmra.mrb[0].mxu0 %v347_v1  ;;  %v348_v16 = vsub.f32 %v4041_v43, %v347_v1 }
  0x8d   :  { %v4068_v17 = vpop.permute.xlu1 %68  ;;  %2999 = vmatprep.mubr.f32.mxu0 %v357_v39  ;;  %v4070_v33 = vpop.permute.xlu0 %65  ;;  %3335 = vmatpush3.bf16.msra.mxu0 %v3899_v31  ;;  %v368_v37 = vsub.f32 %v4039_v40, %v367_v57 }
  0x8e   :  { %4939 = vst [vmem:[#allocation9_spill] sm:$0xff] %v4063_v15  ;;  %4940 = vst [vmem:[#allocation10_spill] sm:$0xff] %v4065_v53  ;;  %vm149_vm6 = vcmp.eq.s32.totalorder %v4068_v17, %v3997_v51  ;;  %vm148_vm7 = vcmp.eq.s32.totalorder %v4070_v33, %v3997_v51  ;;  %v349_v46 = vand.u32 4294901760, %v348_v16  ;;  %v377_v5 = vand.u32 4294901760, %v4065_v53  ;;  %3337 = vmatprep.subr.bf16.mxu0 %v3787_v56 }
  0x8f   :  { %v2315_v6 = vsel %vm149_vm6, 1.0, %v4878_v42  ;;  %v2314_v31 = vsel %vm148_vm7, 1.0, %v4878_v42  ;;  %v387_v25 = vand.u32 4294901760, %v4063_v15  ;;  %v369_v11 = vand.u32 4294901760, %v368_v37 }
  0x90   :  { %v4089_v30 = vsub.f32 %v2315_v6, %v2315_v6  ;;  %v4091_v39 = vsub.f32 %v2314_v31, %v2314_v31  ;;  %2757 = vmatmul.mubr.f32.vlgmr.msra.gmra.mrb[0].mxu1 %v349_v46  ;;  %3000 = vmatmul.mubr.f32.gmra.mrb[2].mxu0 %v367_v57  ;;  %v378_v49 = vsub.f32 %v4065_v53, %v377_v5 }
  0x91   :  { %3239 = vmatpush3.bf16.msra.mxu1 %v3897_v26  ;;  %v4095_v61 = vpop.permute.xlu1 %74  ;;  %2759 = vmatprep.mubr.f32.mxu1 %v359_v24  ;;  %v4097_v1 = vpop.permute.xlu0 %71  ;;  %v388_v50 = vsub.f32 %v4063_v15, %v387_v25 }
  0x92   :  { %4941 = vst [vmem:[#allocation11_spill] sm:$0xff] %v4089_v30  ;;  %4942 = vst [vmem:[#allocation12_spill] sm:$0xff] %v4091_v39  ;;  %vm4934_vm8 = vcmp.eq.s32.totalorder %v4095_v61, %v3997_v51  ;;  %3002 = vmatprep.mubr.f32.mxu0 %v377_v5  ;;  %vm150_vm9 = vcmp.eq.s32.totalorder %v4097_v1, %v3997_v51  ;;  %v379_v57 = vand.u32 4294901760, %v378_v49  ;;  %v397_v14 = vand.u32 4294901760, %v4091_v39 }
  0x93   :  { %3241 = vmatprep.subr.bf16.mxu1 %v3819_v4  ;;  %v2317_v26 = vsel %vm4934_vm8, 1.0, %v4878_v42  ;;  %v2316_v16 = vsel %vm150_vm9, 1.0, %v4878_v42  ;;  %v407_v37 = vand.u32 4294901760, %v4089_v30  ;;  %3339 = vmatpush3.bf16.msra.mxu0 %v3787_v56  ;;  %v389_v49 = vand.u32 4294901760, %v388_v50 }
  0x94   :  { %v4116_v46 = vsub.f32 %v2317_v26, %v2317_v26  ;;  %v4118_v5 = vsub.f32 %v2316_v16, %v2316_v16  ;;  %2760 = vmatmul.mubr.f32.gmra.mrb[2].mxu1 %v369_v11  ;;  %3003 = vmatmul.mubr.f32.gmra.mrb[4].mxu0 %v387_v25  ;;  %v398_v6 = vsub.f32 %v4091_v39, %v397_v14  ;;  %v4945_v11 = vmov 0.0  }
  0x95   :  { %v4121_v31 = vpop.permute.xlu1 %80  ;;  %2762 = vmatprep.mubr.f32.mxu1 %v379_v57  ;;  %3005 = vmatprep.mubr.f32.mxu0 %v397_v14  ;;  %v4123_v24 = vpop.permute.xlu0 %77  ;;  %v408_v42 = vsub.f32 %v4089_v30, %v407_v37 }
  0x96   :  { %4943 = vst [vmem:[#allocation13_spill] sm:$0xff] %v4116_v46  ;;  %4944 = vst [vmem:[#allocation14_spill] sm:$0xff] %v4118_v5  ;;  %vm4932_vm10 = vcmp.eq.s32.totalorder %v4121_v31, %v3997_v51  ;;  %vm4930_vm11 = vcmp.eq.s32.totalorder %v4123_v24, %v3997_v51  ;;  %3243 = vmatpush3.bf16.msra.mxu1 %v3819_v4  ;;  %v399_v56 = vand.u32 4294901760, %v398_v6  ;;  %v417_v25 = vand.u32 4294901760, %v4118_v5 }
  0x97   :  { %3341 = vmatprep.subr.bf16.mxu0 %v3855_v18  ;;  %v2319_v50 = vsel %vm4932_vm10, 1.0, %v4945_v11  ;;  %v2318_v57 = vsel %vm4930_vm11, 1.0, %v4945_v11  ;;  %v427_v14 = vand.u32 4294901760, %v4116_v46  ;;  %3245 = vmatprep.subr.bf16.mxu1 %v3873_v35  ;;  %v409_v39 = vand.u32 4294901760, %v408_v42 }
  0x98   :  { %3343 = vmatpush3.bf16.msra.mxu0 %v3855_v18  ;;  %v4144_v4 = vsub.f32 %v2319_v50, %v2319_v50  ;;  %v4146_v26 = vsub.f32 %v2318_v57, %v2318_v57  ;;  %2763 = vmatmul.mubr.f32.gmra.mrb[4].mxu1 %v389_v49  ;;  %v418_v16 = vsub.f32 %v4118_v5, %v417_v25 }
  0x99   :  { %3006 = vmatmul.mubr.f32.gmra.mrb[6].mxu0 %v407_v37  ;;  %v4149_v6 = vpop.permute.xlu1 %86  ;;  %2765 = vmatprep.mubr.f32.mxu1 %v399_v56  ;;  %v4151_v30 = vpop.permute.xlu0 %83  ;;  %v428_v15 = vsub.f32 %v4116_v46, %v427_v14 }
  0x9a   :  { %4946 = vst [vmem:[#allocation15_spill] sm:$0xff] %v4144_v4  ;;  %4947 = vst [vmem:[#allocation16_spill] sm:$0xff] %v4146_v26  ;;  %3008 = vmatprep.mubr.f32.mxu0 %v417_v25  ;;  %vm4933_vm12 = vcmp.eq.s32.totalorder %v4149_v6, %v3997_v51  ;;  %vm4931_vm13 = vcmp.eq.s32.totalorder %v4151_v30, %v3997_v51  ;;  %v419_v18 = vand.u32 4294901760, %v418_v16  ;;  %v437_v37 = vand.u32 4294901760, %v4146_v26 }
  0x9b   :  { %3247 = vmatpush3.bf16.msra.mxu1 %v3873_v35  ;;  %3345 = vmatprep.subr.bf16.mxu0 %v3903_v58  ;;  %v2321_v42 = vsel %vm4933_vm12, 1.0, %v4945_v11  ;;  %v2320_v49 = vsel %vm4931_vm13, 1.0, %v4945_v11  ;;  %v447_v56 = vand.u32 4294901760, %v4144_v4  ;;  %v429_v46 = vand.u32 4294901760, %v428_v15 }
  0x9c   :  { %3249 = vmatprep.subr.bf16.mxu1 %v3915_v2  ;;  %3347 = vmatpush3.bf16.msra.mxu0 %v3903_v58  ;;  %v4172_v25 = vsub.f32 %v2321_v42, %v2321_v42  ;;  %v4174_v35 = vsub.f32 %v2320_v49, %v2320_v49  ;;  %v438_v50 = vsub.f32 %v4146_v26, %v437_v37 }
  0x9d   :  { %2766 = vmatmul.mubr.f32.gmra.mrb[6].mxu1 %v409_v39  ;;  %3009 = vmatmul.mubr.f32.gmra.mrb[8].mxu0 %v427_v14  ;;  %v4177_v57 = vpop.permute.xlu1 %92  ;;  %v4179_v16 = vpop.permute.xlu0 %89  ;;  %v448_v5 = vsub.f32 %v4144_v4, %v447_v56 }
  0x9e   :  { %4948 = vst [vmem:[#allocation17_spill] sm:$0xff] %v4172_v25  ;;  %4949 = vst [vmem:[#allocation18_spill] sm:$0xff] %v4174_v35  ;;  %2768 = vmatprep.mubr.f32.mxu1 %v419_v18  ;;  %3011 = vmatprep.mubr.f32.mxu0 %v437_v37  ;;  %vm4887_vm14 = vcmp.eq.s32.totalorder %v4177_v57, %v3997_v51  ;;  %vm4888_vm15 = vcmp.eq.s32.totalorder %v4179_v16, %v3997_v51  ;;  %v439_v58 = vand.u32 4294901760, %v438_v50 }
  0x9f   :  { %v457_v39 = vand.u32 4294901760, %v4174_v35  ;;  %3251 = vmatpush3.bf16.msra.mxu1 %v3915_v2  ;;  %3349 = vmatprep.subr.bf16.mxu0 %v3929_v20  ;;  %v2323_v15 = vsel %vm4887_vm14, 1.0, %v4945_v11  ;;  %v2322_v14 = vsel %vm4888_vm15, 1.0, %v4945_v11  ;;  %v467_v18 = vand.u32 4294901760, %v4172_v25 }
  0xa0   :  { %3253 = vmatprep.subr.bf16.mxu1 %v3937_v21  ;;  %3351 = vmatpush3.bf16.msra.mxu0 %v3929_v20  ;;  %v4200_v37 = vsub.f32 %v2323_v15, %v2323_v15  ;;  %v4202_v2 = vsub.f32 %v2322_v14, %v2322_v14  ;;  %v449_v4 = vand.u32 4294901760, %v448_v5 }
  0xa1   :  { %2769 = vmatmul.mubr.f32.gmra.mrb[8].mxu1 %v429_v46  ;;  %3012 = vmatmul.mubr.f32.gmra.mrb[10].mxu0 %v447_v56  ;;  %v458_v42 = vsub.f32 %v4174_v35, %v457_v39  ;;  %v4205_v49 = vpop.permute.xlu1 %98  ;;  %v4207_v50 = vpop.permute.xlu0 %95  ;;  %v468_v26 = vsub.f32 %v4172_v25, %v467_v18 }
  0xa2   :  { %4950 = vst [vmem:[#allocation19_spill] sm:$0xff] %v4200_v37  ;;  %4951 = vst [vmem:[#allocation20_spill] sm:$0xff] %v4202_v2  ;;  %2771 = vmatprep.mubr.f32.mxu1 %v439_v58  ;;  %3014 = vmatprep.mubr.f32.mxu0 %v457_v39  ;;  %vm4891_vm14 = vcmp.eq.s32.totalorder %v4205_v49, %v3997_v51  ;;  %vm4892_vm15 = vcmp.eq.s32.totalorder %v4207_v50, %v3997_v51  ;;  %v477_v46 = vand.u32 4294901760, %v4202_v2 }
  0xa3   :  { %v459_v20 = vand.u32 4294901760, %v458_v42  ;;  %3255 = vmatpush3.bf16.msra.mxu1 %v3937_v21  ;;  %3353 = vmatprep.subr.bf16.mxu0 %v3951_v54  ;;  %v2325_v5 = vsel %vm4891_vm14, 1.0, %v4945_v11  ;;  %v2324_v56 = vsel %vm4892_vm15, 1.0, %v4945_v11  ;;  %v487_v58 = vand.u32 4294901760, %v4200_v37 }
  0xa4   :  { %3257 = vmatprep.subr.bf16.mxu1 %v3959_v55  ;;  %3355 = vmatpush3.bf16.msra.mxu0 %v3951_v54  ;;  %v4228_v39 = vsub.f32 %v2325_v5, %v2325_v5  ;;  %v4230_v21 = vsub.f32 %v2324_v56, %v2324_v56  ;;  %v478_v15 = vsub.f32 %v4202_v2, %v477_v46  ;;  %v469_v25 = vand.u32 4294901760, %v468_v26 }
  0xa5   :  { %2772 = vmatmul.mubr.f32.gmra.mrb[10].mxu1 %v449_v4  ;;  %3015 = vmatmul.mubr.f32.gmra.mrb[12].mxu0 %v467_v18  ;;  %v4233_v14 = vpop.permute.xlu1 %104  ;;  %v4235_v42 = vpop.permute.xlu0 %101  ;;  %v488_v35 = vsub.f32 %v4200_v37, %v487_v58  ;;  %v5016_v52 = vld [vmem:[#allocation18_spill] sm:$0xff]  ;;  %v5018_v41 = vld [vmem:[#allocation17_spill] sm:$0xff] }
  0xa6   :  { %4952 = vst [vmem:[#allocation21_spill] sm:$0xff] %v4228_v39  ;;  %4953 = vst [vmem:[#allocation22_spill] sm:$0xff] %v4230_v21  ;;  %2774 = vmatprep.mubr.f32.mxu1 %v459_v20  ;;  %3017 = vmatprep.mubr.f32.mxu0 %v477_v46  ;;  %vm4895_vm14 = vcmp.eq.s32.totalorder %v4233_v14, %v3997_v51  ;;  %vm4896_vm15 = vcmp.eq.s32.totalorder %v4235_v42, %v3997_v51  ;;  %v479_v54 = vand.u32 4294901760, %v478_v15 }
  0xa7   :  { %v497_v4 = vand.u32 4294901760, %v4230_v21  ;;  %3259 = vmatpush3.bf16.msra.mxu1 %v3959_v55  ;;  %3357 = vmatprep.subr.bf16.mxu0 %v3961_v10  ;;  %v2327_v26 = vsel %vm4895_vm14, 1.0, %v4945_v11  ;;  %v2326_v18 = vsel %vm4896_vm15, 1.0, %v4945_v11  ;;  %v507_v20 = vand.u32 4294901760, %v4228_v39 }
  0xa8   :  { %3261 = vmatprep.subr.bf16.mxu1 %v3969_v63  ;;  %3359 = vmatpush3.bf16.msra.mxu0 %v3961_v10  ;;  %v4256_v46 = vsub.f32 %v2327_v26, %v2327_v26  ;;  %v4258_v55 = vsub.f32 %v2326_v18, %v2326_v18  ;;  %v489_v37 = vand.u32 4294901760, %v488_v35 }
  0xa9   :  { %2775 = vmatmul.mubr.f32.gmra.mrb[12].mxu1 %v469_v25  ;;  %3018 = vmatmul.mubr.f32.gmra.mrb[14].mxu0 %v487_v58  ;;  %v498_v5 = vsub.f32 %v4230_v21, %v497_v4  ;;  %v4261_v56 = vpop.permute.xlu1 %110  ;;  %v4263_v15 = vpop.permute.xlu0 %107  ;;  %v508_v2 = vsub.f32 %v4228_v39, %v507_v20  ;;  %v5020_v8 = vld [vmem:[#allocation20_spill] sm:$0xff]  ;;  %v5022_v9 = vld [vmem:[#allocation19_spill] sm:$0xff] }
  0xaa   :  { %4954 = vst [vmem:[#allocation23_spill] sm:$0xff] %v4256_v46  ;;  %4955 = vst [vmem:[#allocation24_spill] sm:$0xff] %v4258_v55  ;;  %2777 = vmatprep.mubr.f32.mxu1 %v479_v54  ;;  %3020 = vmatprep.mubr.f32.mxu0 %v497_v4  ;;  %vm4899_vm14 = vcmp.eq.s32.totalorder %v4261_v56, %v3997_v51  ;;  %vm4900_vm15 = vcmp.eq.s32.totalorder %v4263_v15, %v3997_v51  ;;  %v517_v25 = vand.u32 4294901760, %v4258_v55 }
  0xab   :  { %v499_v10 = vand.u32 4294901760, %v498_v5  ;;  %3263 = vmatpush3.bf16.msra.mxu1 %v3969_v63  ;;  %3361 = vmatprep.subr.bf16.mxu0 %v3971_v32  ;;  %v2329_v35 = vsel %vm4899_vm14, 1.0, %v4945_v11  ;;  %v2328_v58 = vsel %vm4900_vm15, 1.0, %v4945_v11  ;;  %v527_v54 = vand.u32 4294901760, %v4256_v46 }
  0xac   :  { %3265 = vmatprep.subr.bf16.mxu1 %v3973_v38  ;;  %3363 = vmatpush3.bf16.msra.mxu0 %v3971_v32  ;;  %v4284_v4 = vsub.f32 %v2329_v35, %v2329_v35  ;;  %v4286_v63 = vsub.f32 %v2328_v58, %v2328_v58  ;;  %v518_v26 = vsub.f32 %v4258_v55, %v517_v25  ;;  %v509_v39 = vand.u32 4294901760, %v508_v2 }
  0xad   :  { %2778 = vmatmul.mubr.f32.gmra.mrb[14].mxu1 %v489_v37  ;;  %3021 = vmatmul.mubr.f32.gmra.mrb[16].mxu0 %v507_v20  ;;  %v4289_v18 = vpop.permute.xlu1 %116  ;;  %v4291_v5 = vpop.permute.xlu0 %113  ;;  %v528_v21 = vsub.f32 %v4256_v46, %v527_v54  ;;  %v5026_v59 = vld [vmem:[#allocation21_spill] sm:$0xff] }
  0xae   :  { %4956 = vst [vmem:[#allocation25_spill] sm:$0xff] %v4284_v4  ;;  %4957 = vst [vmem:[#allocation26_spill] sm:$0xff] %v4286_v63  ;;  %2780 = vmatprep.mubr.f32.mxu1 %v499_v10  ;;  %3023 = vmatprep.mubr.f32.mxu0 %v517_v25  ;;  %vm4903_vm14 = vcmp.eq.s32.totalorder %v4289_v18, %v3997_v51  ;;  %vm4904_vm15 = vcmp.eq.s32.totalorder %v4291_v5, %v3997_v51  ;;  %v519_v32 = vand.u32 4294901760, %v518_v26 }
  0xaf   :  { %v537_v37 = vand.u32 4294901760, %v4286_v63  ;;  %3267 = vmatpush3.bf16.msra.mxu1 %v3973_v38  ;;  %3365 = vmatprep.subr.bf16.mxu0 %v3663_v19  ;;  %v2331_v2 = vsel %vm4903_vm14, 1.0, %v4945_v11  ;;  %v2330_v20 = vsel %vm4904_vm15, 1.0, %v4945_v11  ;;  %v547_v10 = vand.u32 4294901760, %v4284_v4 }
  0xb0   :  { %3269 = vmatprep.subr.bf16.mxu1 %v3977_v0  ;;  %v4311_v25 = vsub.f32 %v2331_v2, %v2331_v2  ;;  %v4313_v35 = vsub.f32 %v2330_v20, %v2330_v20  ;;  %v529_v46 = vand.u32 4294901760, %v528_v21 }
  0xb1   :  { %2781 = vmatmul.mubr.f32.gmra.mrb[16].mxu1 %v509_v39  ;;  %3024 = vmatmul.mubr.f32.gmra.mrb[18].mxu0 %v527_v54  ;;  %v538_v38 = vsub.f32 %v4286_v63, %v537_v37  ;;  %v4316_v58 = vpop.permute.xlu1 %122  ;;  %v4318_v26 = vpop.permute.xlu0 %119  ;;  %v548_v55 = vsub.f32 %v4284_v4, %v547_v10  ;;  %v5028_v60 = vld [vmem:[#allocation24_spill] sm:$0xff]  ;;  %v5030_v17 = vld [vmem:[#allocation23_spill] sm:$0xff] }
  0xb2   :  { %4958 = vst [vmem:[#allocation27_spill] sm:$0xff] %v4311_v25  ;;  %4959 = vst [vmem:[#allocation28_spill] sm:$0xff] %v4313_v35  ;;  %2783 = vmatprep.mubr.f32.mxu1 %v519_v32  ;;  %3026 = vmatprep.mubr.f32.mxu0 %v537_v37  ;;  %vm4909_vm14 = vcmp.eq.s32.totalorder %v4316_v58, %v3997_v51  ;;  %vm4910_vm15 = vcmp.eq.s32.totalorder %v4318_v26, %v3997_v51  ;;  %v557_v39 = vand.u32 4294901760, %v4313_v35 }
  0xb3   :  { %v539_v2 = vand.u32 4294901760, %v538_v38  ;;  %v2333_v54 = vsel %vm4909_vm14, 1.0, %v4945_v11  ;;  %v2332_v21 = vsel %vm4910_vm15, 1.0, %v4945_v11  ;;  %v567_v32 = vand.u32 4294901760, %v4311_v25 }
  0xb4   :  { %v4335_v37 = vsub.f32 %v2333_v54, %v2333_v54  ;;  %v4337_v20 = vsub.f32 %v2332_v21, %v2332_v21  ;;  %v558_v38 = vsub.f32 %v4313_v35, %v557_v39  ;;  %v549_v53 = vand.u32 4294901760, %v548_v55 }
  0xb5   :  { %2784 = vmatmul.mubr.f32.gmra.mrb[18].mxu1 %v529_v46  ;;  %3027 = vmatmul.mubr.f32.gmra.mrb[20].mxu0 %v547_v10  ;;  %v4340_v4 = vpop.permute.xlu1 %128  ;;  %v4342_v63 = vpop.permute.xlu0 %125  ;;  %v568_v40 = vsub.f32 %v4311_v25, %v567_v32  ;;  %v5032_v33 = vld [vmem:[#allocation26_spill] sm:$0xff] }
  0xb6   :  { %4960 = vst [vmem:[#allocation29_spill] sm:$0xff] %v4335_v37  ;;  %4961 = vst [vmem:[#allocation30_spill] sm:$0xff] %v4337_v20  ;;  %2786 = vmatprep.mubr.f32.mxu1 %v539_v2  ;;  %3029 = vmatprep.mubr.f32.mxu0 %v557_v39  ;;  %vm4915_vm14 = vcmp.eq.s32.totalorder %v4340_v4, %v3997_v51  ;;  %vm4916_vm15 = vcmp.eq.s32.totalorder %v4342_v63, %v3997_v51  ;;  %v559_v54 = vand.u32 4294901760, %v558_v38 }
  0xb7   :  { %v577_v46 = vand.u32 4294901760, %v4337_v20  ;;  %v2335_v10 = vsel %vm4915_vm14, 1.0, %v4945_v11  ;;  %v2334_v55 = vsel %vm4916_vm15, 1.0, %v4945_v11  ;;  %v587_v2 = vand.u32 4294901760, %v4335_v37 }
  0xb8   :  { %v4359_v39 = vsub.f32 %v2335_v10, %v2335_v10  ;;  %v4361_v21 = vsub.f32 %v2334_v55, %v2334_v55  ;;  %v569_v44 = vand.u32 4294901760, %v568_v40 }
  0xb9   :  { %2787 = vmatmul.mubr.f32.gmra.mrb[20].mxu1 %v549_v53  ;;  %3030 = vmatmul.mubr.f32.gmra.mrb[22].mxu0 %v567_v32  ;;  %v578_v38 = vsub.f32 %v4337_v20, %v577_v46  ;;  %v4364_v25 = vpop.permute.xlu1 %134  ;;  %v4366_v35 = vpop.permute.xlu0 %131  ;;  %v588_v43 = vsub.f32 %v4335_v37, %v587_v2  ;;  %v5038_v1 = vld [vmem:[#allocation27_spill] sm:$0xff] }
  0xba   :  { %4962 = vst [vmem:[#allocation31_spill] sm:$0xff] %v4359_v39  ;;  %4963 = vst [vmem:[#allocation32_spill] sm:$0xff] %v4361_v21  ;;  %2789 = vmatprep.mubr.f32.mxu1 %v559_v54  ;;  %3032 = vmatprep.mubr.f32.mxu0 %v577_v46  ;;  %vm4922_vm14 = vcmp.eq.s32.totalorder %v4364_v25, %v3997_v51  ;;  %vm4923_vm15 = vcmp.eq.s32.totalorder %v4366_v35, %v3997_v51  ;;  %v597_v53 = vand.u32 4294901760, %v4361_v21 }
  0xbb   :  { %4964 = vst [vmem:[#allocation33_spill] sm:$0xff] %v4364_v25  ;;  %4965 = vst [vmem:[#allocation34_spill] sm:$0xff] %v4366_v35  ;;  %v579_v10 = vand.u32 4294901760, %v578_v38  ;;  %v2337_v32 = vsel %vm4922_vm14, 1.0, %v4945_v11  ;;  %v2336_v40 = vsel %vm4923_vm15, 1.0, %v4945_v11  ;;  %v607_v54 = vand.u32 4294901760, %v4359_v39 }
  0xbc   :  { %v4383_v46 = vsub.f32 %v2337_v32, %v2337_v32  ;;  %v4385_v55 = vsub.f32 %v2336_v40, %v2336_v40  ;;  %v598_v38 = vsub.f32 %v4361_v21, %v597_v53  ;;  %v589_v45 = vand.u32 4294901760, %v588_v43 }
  0xbd   :  { %2790 = vmatmul.mubr.f32.gmra.mrb[22].mxu1 %v569_v44  ;;  %3033 = vmatmul.mubr.f32.gmra.mrb[24].mxu0 %v587_v2  ;;  %v4388_v37 = vpop.permute.xlu1 %140  ;;  %v4390_v20 = vpop.permute.xlu0 %137  ;;  %v608_v25 = vsub.f32 %v4359_v39, %v607_v54 }
  0xbe   :  { %4966 = vst [vmem:[#allocation35_spill] sm:$0xff] %v4388_v37  ;;  %2792 = vmatprep.mubr.f32.mxu1 %v579_v10  ;;  %3035 = vmatprep.mubr.f32.mxu0 %v597_v53  ;;  %vm173_vm14 = vcmp.eq.s32.totalorder %v4388_v37, %v3997_v51  ;;  %vm172_vm15 = vcmp.eq.s32.totalorder %v4390_v20, %v3997_v51  ;;  %v599_v32 = vand.u32 4294901760, %v598_v38  ;;  %v617_v44 = vand.u32 4294901760, %v4385_v55 }
  0xbf   :  { %v2339_v2 = vsel %vm173_vm14, 1.0, %v4945_v11  ;;  %v2338_v43 = vsel %vm172_vm15, 1.0, %v4945_v11  ;;  %v627_v10 = vand.u32 4294901760, %v4383_v46  ;;  %v609_v39 = vand.u32 4294901760, %v608_v25 }
  0xc0   :  { %v4407_v53 = vsub.f32 %v2339_v2, %v2339_v2  ;;  %v4409_v40 = vsub.f32 %v2338_v43, %v2338_v43  ;;  %v618_v38 = vsub.f32 %v4385_v55, %v617_v44  ;;  %v3590_v25 = vmov 1.0  }
  0xc1   :  { %2793 = vmatmul.mubr.f32.gmra.mrb[24].mxu1 %v589_v45  ;;  %3036 = vmatmul.mubr.f32.gmra.mrb[26].mxu0 %v607_v54  ;;  %v628_v35 = vsub.f32 %v4383_v46, %v627_v10 }
  0xc2   :  { %2795 = vmatprep.mubr.f32.mxu1 %v599_v32  ;;  %3038 = vmatprep.mubr.f32.mxu0 %v617_v44  ;;  %v619_v21 = vand.u32 4294901760, %v618_v38  ;;  %v637_v37 = vand.u32 4294901760, %v4409_v40  ;;  %v647_v11 = vand.u32 4294901760, %v4407_v53 }
  0xc3   :  { %v629_v45 = vand.u32 4294901760, %v628_v35 }
  0xc4   :  { %v638_v2 = vsub.f32 %v4409_v40, %v637_v37  ;;  %v648_v43 = vsub.f32 %v4407_v53, %v647_v11 }
  0xc5   :  { %2796 = vmatmul.mubr.f32.gmra.mrb[26].mxu1 %v609_v39  ;;  %3039 = vmatmul.mubr.f32.gmra.mrb[28].mxu0 %v627_v10 }
  0xc6   :  { %2798 = vmatprep.mubr.f32.mxu1 %v619_v21  ;;  %3041 = vmatprep.mubr.f32.mxu0 %v637_v37  ;;  %v639_v54 = vand.u32 4294901760, %v638_v2  ;;  %v649_v32 = vand.u32 4294901760, %v648_v43 }
  0xc9   :  { %2799 = vmatmul.mubr.f32.gmra.mrb[28].mxu1 %v629_v45  ;;  %3042 = vmatmul.mubr.f32.gmra.mrb[30].mxu0 %v647_v11 }
  0xca   :  { %2801 = vmatprep.mubr.f32.mxu1 %v639_v54  ;;  %3076 = vmatprep.mubr.msk.f32.mxu0 %vm142_vm1, %v3590_v25 }
  0xcd   :  { %2802 = vmatmul.mubr.f32.gmra.mrb[30].mxu1 %v649_v32  ;;  %3077 = vmatmul.mubr.msk.f32.vlgmr.msra.gmra.mrb[0].mxu0 %vm143_vm3, %v3590_v25 }
  0xce   :  { %2836 = vmatprep.mubr.msk.f32.mxu1 %vm142_vm1, %v3590_v25  ;;  %3079 = vmatprep.mubr.msk.f32.mxu0 %vm144_vm0, %v3590_v25 }
  0xcf   :  { %3367 = vmatpush3.bf16.msra.mxu0 %v3663_v19  ;;  %v4991_v19 = vld [vmem:[#allocation34_spill] sm:$0xff] }
  0xd0   :  { %3369 = vmatprep.subr.bf16.mxu0 %v3671_v22 }
  0xd1   :  { %2837 = vmatmul.mubr.msk.f32.vlgmr.msra.gmra.mrb[0].mxu1 %vm143_vm3, %v3590_v25  ;;  %3080 = vmatmul.mubr.msk.f32.gmra.mrb[2].mxu0 %vm145_vm2, %v3590_v25 }
  0xd2   :  { %3271 = vmatpush3.bf16.msra.mxu1 %v3977_v0  ;;  %2839 = vmatprep.mubr.msk.f32.mxu1 %vm144_vm0, %v3590_v25  ;;  %v5004_v0 = vld [vmem:[#allocation9_spill] sm:$0xff] }
  0xd3   :  { %3082 = vmatprep.mubr.msk.f32.mxu0 %vm146_vm5, %v3590_v25  ;;  %3273 = vmatprep.subr.bf16.mxu1 %v3981_v3 }
  0xd4   :  { %3371 = vmatpush3.bf16.msra.mxu0 %v3671_v22  ;;  %v4994_v22 = vld [vmem:[#allocation33_spill] sm:$0xff] }
  0xd5   :  { %2840 = vmatmul.mubr.msk.f32.gmra.mrb[2].mxu1 %vm145_vm2, %v3590_v25  ;;  %3083 = vmatmul.mubr.msk.f32.gmra.mrb[4].mxu0 %vm147_vm4, %v3590_v25 }
  0xd6   :  { %2842 = vmatprep.mubr.msk.f32.mxu1 %vm146_vm5, %v3590_v25  ;;  %3085 = vmatprep.mubr.msk.f32.mxu0 %vm148_vm7, %v3590_v25 }
  0xd7   :  { %3275 = vmatpush3.bf16.msra.mxu1 %v3981_v3  ;;  %3373 = vmatprep.subr.bf16.mxu0 %v3701_v29  ;;  %v5005_v3 = vld [vmem:[#allocation12_spill] sm:$0xff] }
  0xd8   :  { %3277 = vmatprep.subr.bf16.mxu1 %v3985_v7  ;;  %3375 = vmatpush3.bf16.msra.mxu0 %v3701_v29 }
  0xd9   :  { %2843 = vmatmul.mubr.msk.f32.gmra.mrb[4].mxu1 %vm147_vm4, %v3590_v25  ;;  %3086 = vmatmul.mubr.msk.f32.gmra.mrb[6].mxu0 %vm149_vm6, %v3590_v25 }
  0xda   :  { %2845 = vmatprep.mubr.msk.f32.mxu1 %vm148_vm7, %v3590_v25  ;;  %3088 = vmatprep.mubr.msk.f32.mxu0 %vm150_vm9, %v3590_v25 }
  0xdb   :  { %3279 = vmatpush3.bf16.msra.mxu1 %v3985_v7  ;;  %3377 = vmatprep.subr.bf16.mxu0 %v3729_v36  ;;  %v5006_v7 = vld [vmem:[#allocation11_spill] sm:$0xff] }
  0xdc   :  { %3281 = vmatprep.subr.bf16.mxu1 %v3989_v13  ;;  %3379 = vmatpush3.bf16.msra.mxu0 %v3729_v36  ;;  %v4999_v36 = vld [vmem:[#allocation6_spill] sm:$0xff] }
  0xdd   :  { %2846 = vmatmul.mubr.msk.f32.gmra.mrb[6].mxu1 %vm149_vm6, %v3590_v25  ;;  %3089 = vmatmul.mubr.msk.f32.gmra.mrb[8].mxu0 %vm4934_vm8, %v3590_v25 }
  0xde   :  { %2848 = vmatprep.mubr.msk.f32.mxu1 %vm150_vm9, %v3590_v25  ;;  %3091 = vmatprep.mubr.msk.f32.mxu0 %vm4930_vm11, %v3590_v25 }
  0xdf   :  { %3283 = vmatpush3.bf16.msra.mxu1 %v3989_v13  ;;  %3381 = vmatprep.subr.bf16.mxu0 %v3764_v48  ;;  %v5008_v13 = vld [vmem:[#allocation14_spill] sm:$0xff] }
  0xe0   :  { %3285 = vmatprep.subr.bf16.mxu1 %v3991_v28  ;;  %3383 = vmatpush3.bf16.msra.mxu0 %v3764_v48  ;;  %v5000_v48 = vld [vmem:[#allocation8_spill] sm:$0xff] }
  0xe1   :  { %2849 = vmatmul.mubr.msk.f32.gmra.mrb[8].mxu1 %vm4934_vm8, %v3590_v25  ;;  %3092 = vmatmul.mubr.msk.f32.gmra.mrb[10].mxu0 %vm4932_vm10, %v3590_v25 }
  0xe2   :  { %2851 = vmatprep.mubr.msk.f32.mxu1 %vm4930_vm11, %v3590_v25  ;;  %3094 = vmatprep.mubr.msk.f32.mxu0 %vm4931_vm13, %v3590_v25  ;;  %vm4967_vm11 = vcmp.eq.s32.totalorder %v4179_v16, %v3997_v51 }
  0xe3   :  { %3287 = vmatpush3.bf16.msra.mxu1 %v3991_v28  ;;  %3385 = vmatprep.subr.bf16.mxu0 %v3804_v62  ;;  %v5010_v28 = vld [vmem:[#allocation13_spill] sm:$0xff] }
  0xe4   :  { %3289 = vmatprep.subr.bf16.mxu1 %v3993_v34  ;;  %3387 = vmatpush3.bf16.msra.mxu0 %v3804_v62  ;;  %v5001_v62 = vld [vmem:[#allocation5_spill] sm:$0xff] }
  0xe5   :  { %2852 = vmatmul.mubr.msk.f32.gmra.mrb[10].mxu1 %vm4932_vm10, %v3590_v25  ;;  %3095 = vmatmul.mubr.msk.f32.gmra.mrb[12].mxu0 %vm4933_vm12, %v3590_v25  ;;  %vm4969_vm10 = vcmp.eq.s32.totalorder %v4207_v50, %v3997_v51 }
  0xe6   :  { %2854 = vmatprep.mubr.msk.f32.mxu1 %vm4931_vm13, %v3590_v25  ;;  %3097 = vmatprep.mubr.msk.f32.mxu0 %vm4967_vm11, %v3590_v25  ;;  %vm4968_vm13 = vcmp.eq.s32.totalorder %v4177_v57, %v3997_v51 }
  0xe7   :  { %3291 = vmatpush3.bf16.msra.mxu1 %v3993_v34  ;;  %3389 = vmatprep.subr.bf16.mxu0 %v3848_v12  ;;  %v5012_v34 = vld [vmem:[#allocation16_spill] sm:$0xff] }
  0xe8   :  { %3293 = vmatprep.subr.bf16.mxu1 %v3995_v47  ;;  %3391 = vmatpush3.bf16.msra.mxu0 %v3848_v12  ;;  %v5002_v12 = vld [vmem:[#allocation7_spill] sm:$0xff] }
  0xe9   :  { %2855 = vmatmul.mubr.msk.f32.gmra.mrb[12].mxu1 %vm4933_vm12, %v3590_v25  ;;  %3098 = vmatmul.mubr.msk.f32.gmra.mrb[14].mxu0 %vm4968_vm13, %v3590_v25  ;;  %vm4971_vm12 = vcmp.eq.s32.totalorder %v4235_v42, %v3997_v51 }
  0xea   :  { %2857 = vmatprep.mubr.msk.f32.mxu1 %vm4967_vm11, %v3590_v25  ;;  %3100 = vmatprep.mubr.msk.f32.mxu0 %vm4969_vm10, %v3590_v25  ;;  %vm4970_vm11 = vcmp.eq.s32.totalorder %v4205_v49, %v3997_v51 }
  0xeb   :  { %3295 = vmatpush3.bf16.msra.mxu1 %v3995_v47  ;;  %3393 = vmatprep.subr.bf16.mxu0 %v3871_v27  ;;  %v5014_v47 = vld [vmem:[#allocation15_spill] sm:$0xff] }
  0xec   :  { %3297 = vmatprep.subr.bf16.mxu1 %v4023_v23  ;;  %3395 = vmatpush3.bf16.msra.mxu0 %v3871_v27  ;;  %v5003_v27 = vld [vmem:[#allocation10_spill] sm:$0xff] }
  0xed   :  { %2858 = vmatmul.mubr.msk.f32.gmra.mrb[14].mxu1 %vm4968_vm13, %v3590_v25  ;;  %3101 = vmatmul.mubr.msk.f32.gmra.mrb[16].mxu0 %vm4970_vm11, %v3590_v25  ;;  %vm4972_vm13 = vmmov %vm4970_vm11  ;;  %vm4973_vm11 = vcmp.eq.s32.totalorder %v4233_v14, %v3997_v51 }
  0xee   :  { %2860 = vmatprep.mubr.msk.f32.mxu1 %vm4969_vm10, %v3590_v25  ;;  %3103 = vmatprep.mubr.msk.f32.mxu0 %vm4971_vm12, %v3590_v25  ;;  %vm4974_vm10 = vmmov %vm4971_vm12  ;;  %vm4975_vm12 = vcmp.eq.s32.totalorder %v4263_v15, %v3997_v51 }
  0xef   :  { %3299 = vmatpush3.bf16.msra.mxu1 %v4023_v23  ;;  %vm4976_vm8 = vmmov %vm4973_vm11  ;;  %v5024_v23 = vld [vmem:[#allocation22_spill] sm:$0xff] }
  0xf1   :  { %2861 = vmatmul.mubr.msk.f32.gmra.mrb[16].mxu1 %vm4972_vm13, %v3590_v25  ;;  %3104 = vmatmul.mubr.msk.f32.gmra.mrb[18].mxu0 %vm4973_vm11, %v3590_v25  ;;  %vm4977_vm13 = vcmp.eq.s32.totalorder %v4261_v56, %v3997_v51  ;;  %vm4978_vm11 = vmmov %vm4975_vm12 }
  0xf2   :  { %2863 = vmatprep.mubr.msk.f32.mxu1 %vm4974_vm10, %v3590_v25  ;;  %3106 = vmatprep.mubr.msk.f32.mxu0 %vm4975_vm12, %v3590_v25  ;;  %vm4979_vm10 = vcmp.eq.s32.totalorder %v4291_v5, %v3997_v51  ;;  %vm4980_vm12 = vmmov %vm4977_vm13 }
  0xf5   :  { %2864 = vmatmul.mubr.msk.f32.gmra.mrb[18].mxu1 %vm4976_vm8, %v3590_v25  ;;  %3107 = vmatmul.mubr.msk.f32.gmra.mrb[20].mxu0 %vm4977_vm13, %v3590_v25  ;;  %vm4981_vm8 = vcmp.eq.s32.totalorder %v4289_v18, %v3997_v51  ;;  %vm4982_vm13 = vmmov %vm4979_vm10 }
  0xf6   :  { %2866 = vmatprep.mubr.msk.f32.mxu1 %vm4978_vm11, %v3590_v25  ;;  %3109 = vmatprep.mubr.msk.f32.mxu0 %vm4979_vm10, %v3590_v25  ;;  %vm4983_vm11 = vcmp.eq.s32.totalorder %v4318_v26, %v3997_v51  ;;  %vm4984_vm10 = vmmov %vm4981_vm8 }
  0xf9   :  { %2867 = vmatmul.mubr.msk.f32.gmra.mrb[20].mxu1 %vm4980_vm12, %v3590_v25  ;;  %3110 = vmatmul.mubr.msk.f32.gmra.mrb[22].mxu0 %vm4981_vm8, %v3590_v25  ;;  %vm4985_vm12 = vcmp.eq.s32.totalorder %v4316_v58, %v3997_v51  ;;  %vm4986_vm8 = vmmov %vm4983_vm11 }
  0xfa   :  { %2869 = vmatprep.mubr.msk.f32.mxu1 %vm4982_vm13, %v3590_v25  ;;  %3112 = vmatprep.mubr.msk.f32.mxu0 %vm4983_vm11, %v3590_v25  ;;  %vm4987_vm13 = vcmp.eq.s32.totalorder %v4342_v63, %v3997_v51  ;;  %vm4988_vm11 = vmmov %vm4985_vm12 }
  0xfd   :  { %2870 = vmatmul.mubr.msk.f32.gmra.mrb[22].mxu1 %vm4984_vm10, %v3590_v25  ;;  %3113 = vmatmul.mubr.msk.f32.gmra.mrb[24].mxu0 %vm4985_vm12, %v3590_v25  ;;  %vm4989_vm10 = vcmp.eq.s32.totalorder %v4340_v4, %v3997_v51  ;;  %vm4990_vm12 = vmmov %vm4987_vm13 }
  0xfe   :  { %2872 = vmatprep.mubr.msk.f32.mxu1 %vm4986_vm8, %v3590_v25  ;;  %3115 = vmatprep.mubr.msk.f32.mxu0 %vm4987_vm13, %v3590_v25  ;;  %vm4992_vm8 = vcmp.eq.s32.totalorder %v4991_v19, %v3997_v51  ;;  %vm4993_vm13 = vmmov %vm4989_vm10 }
 0x101   :  { %2873 = vmatmul.mubr.msk.f32.gmra.mrb[24].mxu1 %vm4988_vm11, %v3590_v25  ;;  %3116 = vmatmul.mubr.msk.f32.gmra.mrb[26].mxu0 %vm4989_vm10, %v3590_v25  ;;  %vm4995_vm11 = vcmp.eq.s32.totalorder %v4994_v22, %v3997_v51  ;;  %vm4996_vm10 = vmmov %vm4992_vm8 }
 0x102   :  { %2875 = vmatprep.mubr.msk.f32.mxu1 %vm4990_vm12, %v3590_v25  ;;  %3118 = vmatprep.mubr.msk.f32.mxu0 %vm4992_vm8, %v3590_v25  ;;  %vm4997_vm12 = vmmov %vm4995_vm11  ;;  %vm5025_vm8 = vcmp.eq.s32.totalorder %v4235_v42, %v3997_v51 }
 0x105   :  { %2876 = vmatmul.mubr.msk.f32.gmra.mrb[26].mxu1 %vm4993_vm13, %v3590_v25  ;;  %3119 = vmatmul.mubr.msk.f32.gmra.mrb[28].mxu0 %vm4995_vm11, %v3590_v25  ;;  %vm5027_vm13 = vcmp.eq.s32.totalorder %v4233_v14, %v3997_v51  ;;  %vm5029_vm11 = vcmp.eq.s32.totalorder %v4263_v15, %v3997_v51 }
 0x106   :  { %2878 = vmatprep.mubr.msk.f32.mxu1 %vm4996_vm10, %v3590_v25  ;;  %3121 = vmatprep.mubr.msk.f32.mxu0 %vm172_vm15, %v3590_v25  ;;  %vm5031_vm10 = vcmp.eq.s32.totalorder %v4261_v56, %v3997_v51 }
 0x109   :  { %2879 = vmatmul.mubr.msk.f32.gmra.mrb[28].mxu1 %vm4997_vm12, %v3590_v25  ;;  %3122 = vmatmul.mubr.msk.f32.gmra.mrb[30].mxu0 %vm173_vm14, %v3590_v25  ;;  %vm5033_vm12 = vcmp.eq.s32.totalorder %v4291_v5, %v3997_v51 }
 0x10a   :  { %2881 = vmatprep.mubr.msk.f32.mxu1 %vm172_vm15, %v3590_v25  ;;  %3156 = vmatprep.mubr.msk.f32.mxu0 %vm142_vm1, %v3590_v25  ;;  %vm5009_vm1 = vcmp.eq.s32.totalorder %v4123_v24, %v3997_v51  ;;  %v5042_v24 = vld [vmem:[#allocation29_spill] sm:$0xff] }
 0x10d   :  { %2882 = vmatmul.mubr.msk.f32.gmra.mrb[30].mxu1 %vm173_vm14, %v3590_v25  ;;  %3157 = vmatmul.mubr.msk.f32.vlgmr.msra.gmra.mrb[0].mxu0 %vm143_vm3, %v3590_v25  ;;  %vm5013_vm3 = vcmp.eq.s32.totalorder %v4151_v30, %v3997_v51  ;;  %v5034_v30 = vld [vmem:[#allocation25_spill] sm:$0xff] }
 0x10e   :  { %2916 = vmatprep.mubr.f32.mxu1 %v4999_v36  ;;  %3159 = vmatprep.mubr.msk.f32.mxu0 %vm144_vm0, %v3590_v25  ;;  %vm5007_vm0 = vcmp.eq.s32.totalorder %v4095_v61, %v3997_v51  ;;  %v5036_v61 = vld [vmem:[#allocation28_spill] sm:$0xff] }
 0x111   :  { %2917 = vmatmul.mubr.f32.vlgmr.msra.gmra.mrb[0].mxu1 %v5000_v48  ;;  %3160 = vmatmul.mubr.msk.f32.gmra.mrb[2].mxu0 %vm145_vm2, %v3590_v25  ;;  %vm5011_vm2 = vcmp.eq.s32.totalorder %v4121_v31, %v3997_v51  ;;  %v5040_v31 = vld [vmem:[#allocation30_spill] sm:$0xff] }
 0x112   :  { %2919 = vmatprep.mubr.f32.mxu1 %v5001_v62  ;;  %3162 = vmatprep.mubr.msk.f32.mxu0 %vm146_vm5, %v3590_v25  ;;  %vm5017_vm5 = vcmp.eq.s32.totalorder %v4179_v16, %v3997_v51 }
 0x115   :  { %2920 = vmatmul.mubr.f32.gmra.mrb[2].mxu1 %v5002_v12  ;;  %3163 = vmatmul.mubr.msk.f32.gmra.mrb[4].mxu0 %vm147_vm4, %v3590_v25  ;;  %vm5015_vm4 = vcmp.eq.s32.totalorder %v4149_v6, %v3997_v51  ;;  %v5044_v6 = vld [vmem:[#allocation32_spill] sm:$0xff] }
 0x116   :  { %2922 = vmatprep.mubr.f32.mxu1 %v5003_v27  ;;  %3165 = vmatprep.mubr.msk.f32.mxu0 %vm148_vm7, %v3590_v25  ;;  %vm5021_vm7 = vcmp.eq.s32.totalorder %v4207_v50, %v3997_v51 }
 0x119   :  { %2923 = vmatmul.mubr.f32.gmra.mrb[4].mxu1 %v5004_v0  ;;  %3166 = vmatmul.mubr.msk.f32.gmra.mrb[6].mxu0 %vm149_vm6, %v3590_v25  ;;  %vm5019_vm6 = vcmp.eq.s32.totalorder %v4177_v57, %v3997_v51  ;;  %v5046_v57 = vld [vmem:[#allocation31_spill] sm:$0xff] }
 0x11a   :  { %2925 = vmatprep.mubr.f32.mxu1 %v5005_v3  ;;  %3168 = vmatprep.mubr.msk.f32.mxu0 %vm150_vm9, %v3590_v25  ;;  %vm5023_vm9 = vcmp.eq.s32.totalorder %v4205_v49, %v3997_v51 }
 0x11d   :  { %2926 = vmatmul.mubr.f32.gmra.mrb[6].mxu1 %v5006_v7  ;;  %3169 = vmatmul.mubr.msk.f32.gmra.mrb[8].mxu0 %vm5007_vm0, %v3590_v25  ;;  %vm5035_vm0 = vcmp.eq.s32.totalorder %v4289_v18, %v3997_v51 }
 0x11e   :  { %2928 = vmatprep.mubr.f32.mxu1 %v5008_v13  ;;  %3171 = vmatprep.mubr.msk.f32.mxu0 %vm5009_vm1, %v3590_v25  ;;  %vm5037_vm1 = vcmp.eq.s32.totalorder %v4318_v26, %v3997_v51 }
 0x121   :  { %2929 = vmatmul.mubr.f32.gmra.mrb[8].mxu1 %v5010_v28  ;;  %3172 = vmatmul.mubr.msk.f32.gmra.mrb[10].mxu0 %vm5011_vm2, %v3590_v25  ;;  %vm5039_vm2 = vcmp.eq.s32.totalorder %v4316_v58, %v3997_v51 }
 0x122   :  { %2931 = vmatprep.mubr.f32.mxu1 %v5012_v34  ;;  %3174 = vmatprep.mubr.msk.f32.mxu0 %vm5013_vm3, %v3590_v25  ;;  %vm5041_vm3 = vcmp.eq.s32.totalorder %v4342_v63, %v3997_v51 }
 0x125   :  { %2932 = vmatmul.mubr.f32.gmra.mrb[10].mxu1 %v5014_v47  ;;  %3175 = vmatmul.mubr.msk.f32.gmra.mrb[12].mxu0 %vm5015_vm4, %v3590_v25  ;;  %vm5043_vm4 = vcmp.eq.s32.totalorder %v4340_v4, %v3997_v51 }
 0x126   :  { %2934 = vmatprep.mubr.f32.mxu1 %v5016_v52  ;;  %3177 = vmatprep.mubr.msk.f32.mxu0 %vm5017_vm5, %v3590_v25  ;;  %vm5045_vm5 = vcmp.eq.s32.totalorder %v4991_v19, %v3997_v51 }
 0x129   :  { %2935 = vmatmul.mubr.f32.gmra.mrb[12].mxu1 %v5018_v41  ;;  %3178 = vmatmul.mubr.msk.f32.gmra.mrb[14].mxu0 %vm5019_vm6, %v3590_v25  ;;  %vm5047_vm6 = vcmp.eq.s32.totalorder %v4994_v22, %v3997_v51 }
 0x12a   :  { %2937 = vmatprep.mubr.f32.mxu1 %v5020_v8  ;;  %3180 = vmatprep.mubr.msk.f32.mxu0 %vm5021_vm7, %v3590_v25 }
 0x12d   :  { %2938 = vmatmul.mubr.f32.gmra.mrb[14].mxu1 %v5022_v9  ;;  %3181 = vmatmul.mubr.msk.f32.gmra.mrb[16].mxu0 %vm5023_vm9, %v3590_v25 }
 0x12e   :  { %2940 = vmatprep.mubr.f32.mxu1 %v5024_v23  ;;  %3183 = vmatprep.mubr.msk.f32.mxu0 %vm5025_vm8, %v3590_v25 }
 0x131   :  { %2941 = vmatmul.mubr.f32.gmra.mrb[16].mxu1 %v5026_v59  ;;  %3184 = vmatmul.mubr.msk.f32.gmra.mrb[18].mxu0 %vm5027_vm13, %v3590_v25 }
 0x132   :  { %2943 = vmatprep.mubr.f32.mxu1 %v5028_v60  ;;  %3186 = vmatprep.mubr.msk.f32.mxu0 %vm5029_vm11, %v3590_v25 }
 0x135   :  { %2944 = vmatmul.mubr.f32.gmra.mrb[18].mxu1 %v5030_v17  ;;  %3187 = vmatmul.mubr.msk.f32.gmra.mrb[20].mxu0 %vm5031_vm10, %v3590_v25 }
 0x136   :  { %2946 = vmatprep.mubr.f32.mxu1 %v5032_v33  ;;  %3189 = vmatprep.mubr.msk.f32.mxu0 %vm5033_vm12, %v3590_v25 }
 0x139   :  { %2947 = vmatmul.mubr.f32.gmra.mrb[20].mxu1 %v5034_v30  ;;  %3190 = vmatmul.mubr.msk.f32.gmra.mrb[22].mxu0 %vm5035_vm0, %v3590_v25 }
 0x13a   :  { %2949 = vmatprep.mubr.f32.mxu1 %v5036_v61  ;;  %3192 = vmatprep.mubr.msk.f32.mxu0 %vm5037_vm1, %v3590_v25 }
 0x13d   :  { %2950 = vmatmul.mubr.f32.gmra.mrb[22].mxu1 %v5038_v1  ;;  %3193 = vmatmul.mubr.msk.f32.gmra.mrb[24].mxu0 %vm5039_vm2, %v3590_v25 }
 0x13e   :  { %2952 = vmatprep.mubr.f32.mxu1 %v5040_v31  ;;  %3195 = vmatprep.mubr.msk.f32.mxu0 %vm5041_vm3, %v3590_v25 }
 0x141   :  { %2953 = vmatmul.mubr.f32.gmra.mrb[24].mxu1 %v5042_v24  ;;  %3196 = vmatmul.mubr.msk.f32.gmra.mrb[26].mxu0 %vm5043_vm4, %v3590_v25 }
 0x142   :  { %2955 = vmatprep.mubr.f32.mxu1 %v5044_v6  ;;  %3198 = vmatprep.mubr.msk.f32.mxu0 %vm5045_vm5, %v3590_v25 }
 0x145   :  { %2956 = vmatmul.mubr.f32.gmra.mrb[26].mxu1 %v5046_v57  ;;  %3199 = vmatmul.mubr.msk.f32.gmra.mrb[28].mxu0 %vm5047_vm6, %v3590_v25 }
 0x146   :  { %2958 = vmatprep.mubr.f32.mxu1 %v4385_v55  ;;  %3201 = vmatprep.mubr.msk.f32.mxu0 %vm172_vm15, %v3590_v25 }
 0x149   :  { %2959 = vmatmul.mubr.f32.gmra.mrb[28].mxu1 %v4383_v46  ;;  %3202 = vmatmul.mubr.msk.f32.gmra.mrb[30].mxu0 %vm173_vm14, %v3590_v25 }
 0x14a   :  { %2961 = vmatprep.mubr.f32.mxu1 %v4409_v40 }
 0x14d   :  { %2962 = vmatmul.mubr.f32.gmra.mrb[30].mxu1 %v4407_v53 }
 0x1e0   :  { %v3158_v16 = vpop.f32.mrb[0].mxu0 }
 0x1e1   :  { %v2038_v49 = vpop.f32.mrb[1].mxu0 }
 0x1e4   :  { %v2918_v50 = vpop.f32.mrb[0].mxu1  ;;  %v3161_v14 = vpop.f32.mrb[2].mxu0 }
 0x1e5   :  { %v3396_v42 = vadd.f32 %v3158_v16, %v2918_v50  ;;  %v1092_v56 = vpop.f32.mrb[1].mxu1  ;;  %v2050_v15 = vpop.f32.mrb[3].mxu0 }
 0x1e6   :  { %v3397_v4 = vadd.f32 %v2038_v49, %v1092_v56 }
 0x1e7   :  { %v2229_v63 = vmul.f32 11.313708, %v3396_v42 }
 0x1e8   :  { %v2228_v18 = vmul.f32 11.313708, %v3397_v4  ;;  %v2921_v5 = vpop.f32.mrb[2].mxu1  ;;  %v3164_v35 = vpop.f32.mrb[4].mxu0 }
 0x1e9   :  { %2261 = vst [vmem:[#allocation2 + $0x8] sm:$0xff] %v2229_v63  ;;  %v3398_v58 = vadd.f32 %v3161_v14, %v2921_v5  ;;  %v1106_v51 = vpop.f32.mrb[3].mxu1  ;;  %v2062_v26 = vpop.f32.mrb[5].mxu0 }
 0x1ea   :  { %2260 = vst [vmem:[#allocation2] sm:$0xff] %v2228_v18  ;;  %v3399_v37 = vadd.f32 %v2050_v15, %v1106_v51 }
 0x1eb   :  { %v2231_v20 = vmul.f32 11.313708, %v3398_v58 }
 0x1ec   :  { %v2230_v39 = vmul.f32 11.313708, %v3399_v37  ;;  %v2924_v21 = vpop.f32.mrb[4].mxu1  ;;  %v3167_v46 = vpop.f32.mrb[6].mxu0 }
 0x1ed   :  { %2263 = vst [vmem:[#allocation2 + $0x18] sm:$0xff] %v2231_v20  ;;  %v3400_v55 = vadd.f32 %v3164_v35, %v2924_v21  ;;  %v1120_v44 = vpop.f32.mrb[5].mxu1  ;;  %v2074_v10 = vpop.f32.mrb[7].mxu0 }
 0x1ee   :  { %2262 = vst [vmem:[#allocation2 + $0x10] sm:$0xff] %v2230_v39  ;;  %v3401_v53 = vadd.f32 %v2062_v26, %v1120_v44 }
 0x1ef   :  { %v2233_v40 = vmul.f32 11.313708, %v3400_v55 }
 0x1f0   :  { %v2232_v38 = vmul.f32 11.313708, %v3401_v53  ;;  %v2927_v11 = vpop.f32.mrb[6].mxu1  ;;  %v3170_v2 = vpop.f32.mrb[8].mxu0 }
 0x1f1   :  { %2265 = vst [vmem:[#allocation2 + $0x28] sm:$0xff] %v2233_v40  ;;  %v3402_v45 = vadd.f32 %v3167_v46, %v2927_v11  ;;  %v1134_v54 = vpop.f32.mrb[7].mxu1  ;;  %v2086_v43 = vpop.f32.mrb[9].mxu0 }
 0x1f2   :  { %2264 = vst [vmem:[#allocation2 + $0x20] sm:$0xff] %v2232_v38  ;;  %v3403_v25 = vadd.f32 %v2074_v10, %v1134_v54 }
 0x1f3   :  { %v2235_v32 = vmul.f32 11.313708, %v3402_v45 }
 0x1f4   :  { %v2234_v19 = vmul.f32 11.313708, %v3403_v25  ;;  %v2930_v22 = vpop.f32.mrb[8].mxu1  ;;  %v3173_v29 = vpop.f32.mrb[10].mxu0 }
 0x1f5   :  { %2267 = vst [vmem:[#allocation2 + $0x38] sm:$0xff] %v2235_v32  ;;  %v3404_v36 = vadd.f32 %v3170_v2, %v2930_v22  ;;  %v1148_v48 = vpop.f32.mrb[9].mxu1  ;;  %v2098_v62 = vpop.f32.mrb[11].mxu0 }
 0x1f6   :  { %2266 = vst [vmem:[#allocation2 + $0x30] sm:$0xff] %v2234_v19  ;;  %v3405_v12 = vadd.f32 %v2086_v43, %v1148_v48 }
 0x1f7   :  { %v2237_v27 = vmul.f32 11.313708, %v3404_v36 }
 0x1f8   :  { %v2236_v0 = vmul.f32 11.313708, %v3405_v12  ;;  %v2933_v3 = vpop.f32.mrb[10].mxu1  ;;  %v3176_v7 = vpop.f32.mrb[12].mxu0 }
 0x1f9   :  { %2269 = vst [vmem:[#allocation2 + $0x48] sm:$0xff] %v2237_v27  ;;  %v3406_v13 = vadd.f32 %v3173_v29, %v2933_v3  ;;  %v1162_v28 = vpop.f32.mrb[11].mxu1  ;;  %v2110_v34 = vpop.f32.mrb[13].mxu0 }
 0x1fa   :  { %2268 = vst [vmem:[#allocation2 + $0x40] sm:$0xff] %v2236_v0  ;;  %v3407_v47 = vadd.f32 %v2098_v62, %v1162_v28 }
 0x1fb   :  { %v2239_v52 = vmul.f32 11.313708, %v3406_v13 }
 0x1fc   :  { %v2238_v41 = vmul.f32 11.313708, %v3407_v47  ;;  %v2936_v8 = vpop.f32.mrb[12].mxu1  ;;  %v3179_v9 = vpop.f32.mrb[14].mxu0 }
 0x1fd   :  { %2271 = vst [vmem:[#allocation2 + $0x58] sm:$0xff] %v2239_v52  ;;  %v3408_v23 = vadd.f32 %v3176_v7, %v2936_v8  ;;  %v1176_v59 = vpop.f32.mrb[13].mxu1  ;;  %v2122_v60 = vpop.f32.mrb[15].mxu0 }
 0x1fe   :  { %2270 = vst [vmem:[#allocation2 + $0x50] sm:$0xff] %v2238_v41  ;;  %v3409_v17 = vadd.f32 %v2110_v34, %v1176_v59 }
 0x1ff   :  { %v2241_v33 = vmul.f32 11.313708, %v3408_v23 }
 0x200   :  { %v2240_v30 = vmul.f32 11.313708, %v3409_v17  ;;  %v2939_v61 = vpop.f32.mrb[14].mxu1  ;;  %v3182_v1 = vpop.f32.mrb[16].mxu0 }
 0x201   :  { %2273 = vst [vmem:[#allocation2 + $0x68] sm:$0xff] %v2241_v33  ;;  %v3410_v31 = vadd.f32 %v3179_v9, %v2939_v61  ;;  %v1190_v24 = vpop.f32.mrb[15].mxu1  ;;  %v2134_v6 = vpop.f32.mrb[17].mxu0 }
 0x202   :  { %2272 = vst [vmem:[#allocation2 + $0x60] sm:$0xff] %v2240_v30  ;;  %v3411_v57 = vadd.f32 %v2122_v60, %v1190_v24 }
 0x203   :  { %v2243_v16 = vmul.f32 11.313708, %v3410_v31 }
 0x204   :  { %v2242_v49 = vmul.f32 11.313708, %v3411_v57  ;;  %v2942_v50 = vpop.f32.mrb[16].mxu1  ;;  %v3185_v14 = vpop.f32.mrb[18].mxu0 }
 0x205   :  { %2275 = vst [vmem:[#allocation2 + $0x78] sm:$0xff] %v2243_v16  ;;  %v3412_v42 = vadd.f32 %v3182_v1, %v2942_v50  ;;  %v1204_v56 = vpop.f32.mrb[17].mxu1  ;;  %v2146_v15 = vpop.f32.mrb[19].mxu0 }
 0x206   :  { %2274 = vst [vmem:[#allocation2 + $0x70] sm:$0xff] %v2242_v49  ;;  %v3413_v4 = vadd.f32 %v2134_v6, %v1204_v56 }
 0x207   :  { %v2245_v63 = vmul.f32 11.313708, %v3412_v42 }
 0x208   :  { %v2244_v18 = vmul.f32 11.313708, %v3413_v4  ;;  %v2945_v5 = vpop.f32.mrb[18].mxu1  ;;  %v3188_v35 = vpop.f32.mrb[20].mxu0 }
 0x209   :  { %2277 = vst [vmem:[#allocation2 + $0x88] sm:$0xff] %v2245_v63  ;;  %v3414_v58 = vadd.f32 %v3185_v14, %v2945_v5  ;;  %v1218_v51 = vpop.f32.mrb[19].mxu1  ;;  %v2158_v26 = vpop.f32.mrb[21].mxu0 }
 0x20a   :  { %2276 = vst [vmem:[#allocation2 + $0x80] sm:$0xff] %v2244_v18  ;;  %v3415_v37 = vadd.f32 %v2146_v15, %v1218_v51 }
 0x20b   :  { %v2247_v20 = vmul.f32 11.313708, %v3414_v58 }
 0x20c   :  { %v2246_v39 = vmul.f32 11.313708, %v3415_v37  ;;  %v2948_v21 = vpop.f32.mrb[20].mxu1  ;;  %v3191_v46 = vpop.f32.mrb[22].mxu0 }
 0x20d   :  { %2279 = vst [vmem:[#allocation2 + $0x98] sm:$0xff] %v2247_v20  ;;  %v3416_v55 = vadd.f32 %v3188_v35, %v2948_v21  ;;  %v1232_v44 = vpop.f32.mrb[21].mxu1  ;;  %v2170_v10 = vpop.f32.mrb[23].mxu0 }
 0x20e   :  { %2278 = vst [vmem:[#allocation2 + $0x90] sm:$0xff] %v2246_v39  ;;  %v3417_v53 = vadd.f32 %v2158_v26, %v1232_v44 }
 0x20f   :  { %v2249_v40 = vmul.f32 11.313708, %v3416_v55 }
 0x210   :  { %v2248_v38 = vmul.f32 11.313708, %v3417_v53  ;;  %v2951_v11 = vpop.f32.mrb[22].mxu1  ;;  %v3194_v2 = vpop.f32.mrb[24].mxu0 }
 0x211   :  { %2281 = vst [vmem:[#allocation2 + $0xa8] sm:$0xff] %v2249_v40  ;;  %v3418_v45 = vadd.f32 %v3191_v46, %v2951_v11  ;;  %v1246_v54 = vpop.f32.mrb[23].mxu1  ;;  %v2182_v43 = vpop.f32.mrb[25].mxu0 }
 0x212   :  { %2280 = vst [vmem:[#allocation2 + $0xa0] sm:$0xff] %v2248_v38  ;;  %v3419_v25 = vadd.f32 %v2170_v10, %v1246_v54 }
 0x213   :  { %v2251_v32 = vmul.f32 11.313708, %v3418_v45 }
 0x214   :  { %v2250_v19 = vmul.f32 11.313708, %v3419_v25  ;;  %v2954_v22 = vpop.f32.mrb[24].mxu1  ;;  %v3197_v29 = vpop.f32.mrb[26].mxu0 }
 0x215   :  { %2283 = vst [vmem:[#allocation2 + $0xb8] sm:$0xff] %v2251_v32  ;;  %v3420_v36 = vadd.f32 %v3194_v2, %v2954_v22  ;;  %v1260_v48 = vpop.f32.mrb[25].mxu1  ;;  %v2194_v62 = vpop.f32.mrb[27].mxu0 }
 0x216   :  { %2282 = vst [vmem:[#allocation2 + $0xb0] sm:$0xff] %v2250_v19  ;;  %v3421_v12 = vadd.f32 %v2182_v43, %v1260_v48 }
 0x217   :  { %v2253_v27 = vmul.f32 11.313708, %v3420_v36 }
 0x218   :  { %v2252_v0 = vmul.f32 11.313708, %v3421_v12  ;;  %v2957_v3 = vpop.f32.mrb[26].mxu1  ;;  %v3200_v7 = vpop.f32.mrb[28].mxu0 }
 0x219   :  { %2285 = vst [vmem:[#allocation2 + $0xc8] sm:$0xff] %v2253_v27  ;;  %v3422_v13 = vadd.f32 %v3197_v29, %v2957_v3  ;;  %v1274_v28 = vpop.f32.mrb[27].mxu1  ;;  %v2206_v34 = vpop.f32.mrb[29].mxu0 }
 0x21a   :  { %2284 = vst [vmem:[#allocation2 + $0xc0] sm:$0xff] %v2252_v0  ;;  %v3423_v47 = vadd.f32 %v2194_v62, %v1274_v28 }
 0x21b   :  { %v2255_v52 = vmul.f32 11.313708, %v3422_v13 }
 0x21c   :  { %v2254_v41 = vmul.f32 11.313708, %v3423_v47  ;;  %v2960_v8 = vpop.f32.mrb[28].mxu1  ;;  %v3203_v9 = vpop.f32.mrb[30].mxu0 }
 0x21d   :  { %2287 = vst [vmem:[#allocation2 + $0xd8] sm:$0xff] %v2255_v52  ;;  %v3424_v23 = vadd.f32 %v3200_v7, %v2960_v8  ;;  %v1288_v59 = vpop.f32.mrb[29].mxu1  ;;  %v2218_v60 = vpop.f32.mrb[31].mxu0 }
 0x21e   :  { %2286 = vst [vmem:[#allocation2 + $0xd0] sm:$0xff] %v2254_v41  ;;  %v3425_v17 = vadd.f32 %v2206_v34, %v1288_v59 }
 0x21f   :  { %v2257_v33 = vmul.f32 11.313708, %v3424_v23 }
 0x220   :  { %v2256_v30 = vmul.f32 11.313708, %v3425_v17  ;;  %v2963_v61 = vpop.f32.mrb[30].mxu1 }
 0x221   :  { %2289 = vst [vmem:[#allocation2 + $0xe8] sm:$0xff] %v2257_v33  ;;  %v3426_v1 = vadd.f32 %v3203_v9, %v2963_v61  ;;  %v1302_v31 = vpop.f32.mrb[31].mxu1 }
 0x222   :  { %2288 = vst [vmem:[#allocation2 + $0xe0] sm:$0xff] %v2256_v30  ;;  %v3427_v24 = vadd.f32 %v2218_v60, %v1302_v31 }
 0x223   :  { %v2259_v6 = vmul.f32 11.313708, %v3426_v1 }
 0x224   :  { %v2258_v57 = vmul.f32 11.313708, %v3427_v24 }
 0x225   :  { %2291 = vst [vmem:[#allocation2 + $0xf8] sm:$0xff] %v2259_v6 }
 0x226   :  { %2290 = vst [vmem:[#allocation2 + $0xf0] sm:$0xff] %v2258_v57 }
 0x227   :  { %3575 = shalt.err (!%p3572_p4)
}
 0x228   :  { %s3576_s23 = scalar_lea.hbm %s4877_s2, 4096 }
 0x229   :  { %p3577_p5 = scmp.ne.s32.totalorder %s4877_s2, %s3576_s23  ;;  %p3580_p6 = scmp.lt.u32.totalorder %s3576_s23, %s4877_s2 }
 0x22b   :  { %p3582_p7 = pnand %p3580_p6, %p3577_p5 }
 0x22d   :  { %3585 = shalt.err (!%p3582_p7)
}
 0x22e   :  { %s3592_s28 = smov 128   ;;  %s3593_s29 = smov 8  }
 0x22f   :  { %2303 = dma.vmem_to_hbm [thread:$0]  %s2298_s20, 4096, %s4877_s2, [#allocation3], %s3592_s28, %s3592_s28, %s3593_s29  }
 0x230   :  { %3586 = dma.done.wait [#allocation3], 4096  }
 0x231   :  { %3587 = vsyncadd [#allocation3], 4294963200 }
 0x232   :  { %2307 = vsyncpa [#allocation3], 1 }

</bundles_post_ra>
